<compile_context>
chip_gen: v6e
topology: v6e:2x2x1
jax: 0.10.0
libtpu: 0.0.40
codegen_flags: <defaults>
</compile_context>

<pallas_src>
import functools
import numpy as np
import jax
import jax.numpy as jnp
from jax.experimental import pallas as pl
from jax.experimental.pallas import tpu as pltpu


# ----------------------------------------------------------------------------
# geopoly: icosahedron basis (helper.generate_basis)
# ----------------------------------------------------------------------------
def _compute_sq_dist(mat0, mat1=None):
    if mat1 is None:
        mat1 = mat0
    sq_norm0 = np.sum(mat0 ** 2, 0)
    sq_norm1 = np.sum(mat1 ** 2, 0)
    sq_dist = sq_norm0[:, None] + sq_norm1[None, :] - 2 * mat0.T @ mat1
    return np.maximum(0, sq_dist)


def _compute_tesselation_weights(v):
    int_weights = []
    for i in range(v + 1):
        for j in range(v + 1 - i):
            int_weights.append((i, j, v - (i + j)))
    return np.array(int_weights) / v


def _tesselate_geodesic(base_verts, base_faces, v, eps=1e-4):
    tri_weights = _compute_tesselation_weights(v)
    verts = []
    for base_face in base_faces:
        new_verts = np.matmul(tri_weights, base_verts[base_face, :])
        new_verts /= np.sqrt(np.sum(new_verts ** 2, 1, keepdims=True))
        verts.append(new_verts)
    verts = np.concatenate(verts, 0)
    sq_dist = _compute_sq_dist(verts.T)
    assignment = np.array([np.min(np.argwhere(d <= eps)) for d in sq_dist])
    unique = np.unique(assignment)
    return verts[unique, :]


def generate_basis(base_shape="icosahedron", angular_tesselation=2,
                   remove_symmetries=True, eps=1e-4):
    assert base_shape == "icosahedron"
    a = (np.sqrt(5) + 1) / 2
    verts = np.array([(-1, 0, a), (1, 0, a), (-1, 0, -a), (1, 0, -a),
                      (0, a, 1), (0, a, -1), (0, -a, 1), (0, -a, -1),
                      (a, 1, 0), (-a, 1, 0), (a, -1, 0), (-a, -1, 0)]) / np.sqrt(a + 2)
    faces = np.array([(0, 4, 1), (0, 9, 4), (9, 5, 4), (4, 5, 8), (4, 8, 1),
                      (8, 10, 1), (8, 3, 10), (5, 3, 8), (5, 2, 3), (2, 7, 3),
                      (7, 10, 3), (7, 6, 10), (7, 11, 6), (11, 0, 6), (0, 1, 6),
                      (6, 1, 10), (9, 0, 11), (9, 11, 2), (9, 2, 5), (7, 2, 11)])
    verts = _tesselate_geodesic(verts, faces, angular_tesselation)
    if remove_symmetries:
        match = _compute_sq_dist(verts.T, -verts.T) < eps
        verts = verts[np.any(np.triu(match), axis=-1), :]
    return verts[:, ::-1]


# ----------------------------------------------------------------------------
# Pallas kernel: whole MLP fused (pts layers + heads + view MLP + rgb)
# ----------------------------------------------------------------------------
def _round_up(x, m):
    return ((x + m - 1) // m) * m


def _softplus(x):
    # stable softplus using only exp/log/abs/max (all EUP/VPU-lowerable)
    return jnp.maximum(x, 0.0) + jnp.log(1.0 + jnp.exp(-jnp.abs(x)))


def _fused_mlp_kernel(*refs, skip_flags, disable_rgb, density_bias, rgb_padding,
                      bott_width, n_view_layers):
    n_out = 1 if disable_rgb else 2
    in_refs = refs[:-n_out]
    out_refs = refs[-n_out:]
    it = iter(in_refs)

    x_ref = next(it)
    dir_ref = None if disable_rgb else next(it)

    x = x_ref[...]                      # bf16 (tm, Kx) — also the skip input
    h = x
    for has_skip in skip_flags:
        w_ref = next(it)
        wx_ref = next(it) if has_skip else None
        b_ref = next(it)
        y = jnp.dot(h, w_ref[...], preferred_element_type=jnp.float32)
        if has_skip:
            # fused skip concat: W pre-split along K -> sum of two matmuls
            y = y + jnp.dot(x, wx_ref[...], preferred_element_type=jnp.float32)
        y = y + b_ref[...]
        h = jnp.maximum(y, 0.0).astype(jnp.bfloat16)

    if disable_rgb:
        dw_ref = next(it)
        db_ref = next(it)
        d = jnp.dot(h, dw_ref[...], preferred_element_type=jnp.float32) + db_ref[...]
        out_refs[0][...] = _softplus(d + density_bias)
        return

    # fused head: columns [0:bott_width) = bottleneck, column bott_width = density
    hw_ref = next(it)
    hb_ref = next(it)
    head = jnp.dot(h, hw_ref[...], preferred_element_type=jnp.float32) + hb_ref[...]
    bott = head[:, :bott_width].astype(jnp.bfloat16)        # lane-aligned slice
    dens = head[:, bott_width:bott_width + 128]              # lane-aligned slab
    out_refs[0][...] = _softplus(dens + density_bias)

    # view MLP layer 0: [bottleneck | dir_enc] concat fused via split-K weights
    vwb_ref = next(it)
    vwd_ref = next(it)
    vb_ref = next(it)
    xv = jnp.dot(bott, vwb_ref[...], preferred_element_type=jnp.float32)
    xv = xv + jnp.dot(dir_ref[...], vwd_ref[...], preferred_element_type=jnp.float32)
    xv = jnp.maximum(xv + vb_ref[...], 0.0).astype(jnp.bfloat16)
    for _ in range(n_view_layers - 1):     # default netdepth_condition=1 -> no-op
        w_ref = next(it)
        b_ref = next(it)
        y = jnp.dot(xv, w_ref[...], preferred_element_type=jnp.float32) + b_ref[...]
        xv = jnp.maximum(y, 0.0).astype(jnp.bfloat16)

    rw_ref = next(it)
    rb_ref = next(it)
    # rgb_premultiplier=1.0, rgb_bias=0.0 -> sigmoid + padding fused in-kernel
    rgb = jnp.dot(xv, rw_ref[...], preferred_element_type=jnp.float32) + rb_ref[...]
    rgb = jax.nn.sigmoid(rgb)
    out_refs[1][...] = rgb * (1.0 + 2.0 * rgb_padding) - rgb_padding


@functools.lru_cache(maxsize=None)
def _build_fused_call(mp, tm, in_shapes, in_dtypes, skip_flags, disable_rgb,
                      density_bias, rgb_padding, bott_width, n_view_layers):
    grid = (mp // tm,)
    n_row_inputs = 1 if disable_rgb else 2

    in_specs = []
    for idx, shp in enumerate(in_shapes):
        if idx < n_row_inputs:
            # row-tiled activations (x / dir_enc)
            in_specs.append(pl.BlockSpec((tm, shp[1]), lambda i: (i, 0)))
        else:
            # weight-stationary: full-array block, constant index -> one DMA/call
            in_specs.append(pl.BlockSpec(shp, lambda i: (0, 0)))

    if disable_rgb:
        out_shape = jax.ShapeDtypeStruct((mp, 128), jnp.float32)
        out_specs = pl.BlockSpec((tm, 128), lambda i: (i, 0))
        n_out = 1
    else:
        out_shape = (jax.ShapeDtypeStruct((mp, 128), jnp.float32),
                     jax.ShapeDtypeStruct((mp, 128), jnp.float32))
        out_specs = (pl.BlockSpec((tm, 128), lambda i: (i, 0)),
                     pl.BlockSpec((tm, 128), lambda i: (i, 0)))
        n_out = 2

    # advisory cost estimate (matmul flops, input+weight+output bytes)
    flops = 0
    bytes_accessed = 0
    for idx, (shp, dt) in enumerate(zip(in_shapes, in_dtypes)):
        bytes_accessed += int(np.prod(shp)) * int(jnp.dtype(dt).itemsize)
        if idx >= n_row_inputs and shp[0] > 1:          # weight (not bias)
            flops += 2 * int(mp) * int(shp[0]) * int(shp[1])
    bytes_accessed += n_out * int(mp) * 128 * 4
    cost = pl.CostEstimate(flops=flops, transcendentals=int(mp) * 256,
                           bytes_accessed=bytes_accessed)

    kernel = functools.partial(
        _fused_mlp_kernel, skip_flags=skip_flags, disable_rgb=disable_rgb,
        density_bias=density_bias, rgb_padding=rgb_padding,
        bott_width=bott_width, n_view_layers=n_view_layers)

    return pl.pallas_call(
        kernel,
        out_shape=out_shape,
        grid_spec=pltpu.PrefetchScalarGridSpec(
            num_scalar_prefetch=0,
            grid=grid,
            in_specs=in_specs,
            out_specs=out_specs),
        compiler_params=pltpu.CompilerParams(
            dimension_semantics=("parallel",),
            vmem_limit_bytes=56 * 1024 * 1024),   # fits v7x 64 MiB/TC budget
        cost_estimate=cost,
    )


def fused_mlp_apply(p, x, dir_enc):
    """Run the whole (padded) MLP of one level in a single Pallas kernel.

    x: (M, F) IPE features; dir_enc: (M, Dv) or None (PropMLP).
    Returns density (M,) or (density (M,), rgb (M, 3))."""
    cfg = p["config"]
    m, f = x.shape
    kx = _round_up(f, 128)
    mp = _round_up(max(m, 16), 16)      # bf16 sublane packing
    if mp > 512:
        tm = 256
        mp = _round_up(mp, tm)
    else:
        tm = mp

    xp = x.astype(jnp.bfloat16)
    if (mp, kx) != (m, f):
        xp = jnp.pad(xp, ((0, mp - m), (0, kx - f)))
    row_inputs = [xp]
    if dir_enc is not None:
        dv = dir_enc.shape[-1]
        kd = _round_up(dv, 128)
        dp = dir_enc.astype(jnp.bfloat16)
        if (mp, kd) != (m, dv):
            dp = jnp.pad(dp, ((0, mp - m), (0, kd - dv)))
        row_inputs.append(dp)

    all_inputs = row_inputs + list(p["flat"])
    call = _build_fused_call(
        mp, tm,
        tuple(tuple(int(s) for s in a.shape) for a in all_inputs),
        tuple(jnp.dtype(a.dtype).name for a in all_inputs),
        p["skip_flags"],
        bool(cfg["disable_rgb"]),
        float(cfg["density_bias"]),
        float(cfg["rgb_padding"]),
        int(p.get("bott_width", 0)),
        int(p.get("n_view_layers", 0)),
    )
    if cfg["disable_rgb"]:
        out_d = call(*all_inputs)
        return out_d[:m, 0]
    out_d, out_rgb = call(*all_inputs)
    return out_d[:m, 0], out_rgb[:m, :3]


# ----------------------------------------------------------------------------
# helper.* math (JAX glue, faithful to mip-NeRF 360 semantics)
# ----------------------------------------------------------------------------
def contract(x):
    eps = jnp.finfo(jnp.float32).eps
    x_mag_sq = jnp.maximum(eps, jnp.sum(x ** 2, axis=-1, keepdims=True))
    z = jnp.where(x_mag_sq <= 1, x, ((2 * jnp.sqrt(x_mag_sq) - 1) / x_mag_sq) * x)
    return z


def contract_tracked(means, covs):
    """helper.contract(means, covs, is_train): warp Gaussians via linearization."""
    fn_mean, lin_fn = jax.linearize(contract, means)
    fn_cov = jax.vmap(lin_fn, in_axes=-1, out_axes=-2)(
        jax.vmap(lin_fn, in_axes=-1, out_axes=-2)(covs))
    return fn_mean, fn_cov


def lift_and_diagonalize(mean, cov, basis):
    fn_mean = mean @ basis
    fn_cov_diag = jnp.sum(basis * (cov @ basis), axis=-2)
    return fn_mean, fn_cov_diag


def integrated_pos_enc(mean, var, min_deg, max_deg):
    scales = 2.0 ** jnp.arange(min_deg, max_deg)
    shape = mean.shape[:-1] + (-1,)
    scaled_mean = (mean[..., None, :] * scales[:, None]).reshape(shape)
    scaled_var = (var[..., None, :] * scales[:, None] ** 2).reshape(shape)
    return jnp.exp(-0.5 * jnp.concatenate([scaled_var] * 2, axis=-1)) * jnp.sin(
        jnp.concatenate([scaled_mean, scaled_mean + 0.5 * jnp.pi], axis=-1))


def pos_enc(x, min_deg, max_deg, append_identity=True):
    scales = 2.0 ** jnp.arange(min_deg, max_deg)
    shape = x.shape[:-1] + (-1,)
    scaled_x = (x[..., None, :] * scales[:, None]).reshape(shape)
    four_feat = jnp.sin(jnp.concatenate([scaled_x, scaled_x + 0.5 * jnp.pi], axis=-1))
    if append_identity:
        return jnp.concatenate([x, four_feat], axis=-1)
    return four_feat


def construct_ray_warps(t_near, t_far):
    fn = lambda x: 1.0 / x
    fn_inv = lambda x: 1.0 / x
    s_near, s_far = fn(t_near), fn(t_far)
    t_to_s = lambda t: (fn(t) - s_near) / (s_far - s_near)
    s_to_t = lambda s: fn_inv(s * s_far + (1 - s) * s_near)
    return t_to_s, s_to_t


def _searchsorted(a, v):
    i = jnp.arange(a.shape[-1])
    v_ge_a = v[..., None, :] >= a[..., :, None]
    idx_lo = jnp.max(jnp.where(v_ge_a, i[:, None], i[:1, None]), axis=-2)
    idx_hi = jnp.min(jnp.where(~v_ge_a, i[:, None], i[-1:, None]), axis=-2)
    return idx_lo, idx_hi


def _sorted_interp(x, xp, fp):
    (xp0, xp1), (fp0, fp1) = [
        [jnp.take_along_axis(f, i, axis=-1) for i in _searchsorted(xp, x)]
        for f in [xp, fp]]
    offset = jnp.clip(jnp.nan_to_num((x - xp0) / (xp1 - xp0)), 0, 1)
    return fp0 + offset * (fp1 - fp0)


def _integrate_weights(w):
    cw = jnp.minimum(1, jnp.cumsum(w[..., :-1], axis=-1))
    shape = cw.shape[:-1] + (1,)
    return jnp.concatenate([jnp.zeros(shape), cw, jnp.ones(shape)], axis=-1)


def _invert_cdf(u, t, w_logits):
    w = jax.nn.softmax(w_logits, axis=-1)
    cw = _integrate_weights(w)
    return _sorted_interp(u, cw, t)


def _sample(randomized, t, w_logits, num_samples, single_jitter=False,
            deterministic_center=False):
    eps = jnp.finfo(jnp.float32).eps
    # TODO(synk): randomized stratified-jitter path (torch.rand) not implemented;
    # the example runs with randomized=False, which uses the deterministic path.
    if deterministic_center:
        pad = 1 / (2 * num_samples)
        u = jnp.linspace(pad, 1.0 - pad - eps, num_samples)
    else:
        u = jnp.linspace(0, 1.0 - eps, num_samples)
    u = jnp.broadcast_to(u, t.shape[:-1] + (num_samples,))
    return _invert_cdf(u, t, w_logits)


def sample_intervals(randomized, t, w_logits, num_samples, single_jitter=False,
                     domain=(-jnp.inf, jnp.inf)):
    centers = _sample(randomized, t, w_logits, num_samples,
                      single_jitter=single_jitter, deterministic_center=True)
    mid = (centers[..., 1:] + centers[..., :-1]) / 2
    first = 2 * centers[..., :1] - mid[..., :1]
    last = 2 * centers[..., -1:] - mid[..., -1:]
    t_samples = jnp.concatenate([first, mid, last], axis=-1)
    return jnp.clip(t_samples, *domain)


def max_dilate(t, w, dilation, domain=(-jnp.inf, jnp.inf)):
    t0 = t[..., :-1] - dilation
    t1 = t[..., 1:] + dilation
    t_dilate = jnp.sort(jnp.concatenate([t, t0, t1], axis=-1), axis=-1)
    t_dilate = jnp.clip(t_dilate, *domain)
    w_dilate = jnp.max(
        jnp.where((t0[..., None, :] <= t_dilate[..., None])
                  & (t1[..., None, :] > t_dilate[..., None]),
                  w[..., None, :], 0),
        axis=-1)[..., :-1]
    return t_dilate, w_dilate


def max_dilate_weights(t, w, dilation, domain=(-jnp.inf, jnp.inf),
                       renormalize=False):
    eps = jnp.finfo(jnp.float32).eps ** 2
    p = w / (t[..., 1:] - t[..., :-1])
    t_dilate, p_dilate = max_dilate(t, p, dilation, domain=domain)
    w_dilate = p_dilate * (t_dilate[..., 1:] - t_dilate[..., :-1])
    if renormalize:
        w_dilate /= jnp.maximum(eps, jnp.sum(w_dilate, axis=-1, keepdims=True))
    return t_dilate, w_dilate


def _lift_gaussian(d, t_mean, t_var, r_var, diag):
    mean = d[..., None, :] * t_mean[..., None]
    d_mag_sq = jnp.maximum(1e-10, jnp.sum(d ** 2, axis=-1, keepdims=True))
    if diag:
        d_outer_diag = d ** 2
        null_outer_diag = 1 - d_outer_diag / d_mag_sq
        t_cov_diag = t_var[..., None] * d_outer_diag[..., None, :]
        xy_cov_diag = r_var[..., None] * null_outer_diag[..., None, :]
        return mean, t_cov_diag + xy_cov_diag
    d_outer = d[..., :, None] * d[..., None, :]
    eye = jnp.eye(d.shape[-1])
    null_outer = eye - d[..., :, None] * (d / d_mag_sq)[..., None, :]
    t_cov = t_var[..., None, None] * d_outer[..., None, :, :]
    xy_cov = r_var[..., None, None] * null_outer[..., None, :, :]
    return mean, t_cov + xy_cov


def _conical_frustum_to_gaussian(d, t0, t1, base_radius, diag):
    mu = (t0 + t1) / 2
    hw = (t1 - t0) / 2
    t_mean = mu + (2 * mu * hw ** 2) / (3 * mu ** 2 + hw ** 2)
    t_var = (hw ** 2) / 3 - (4 / 15) * ((hw ** 4 * (12 * mu ** 2 - hw ** 2)) /
                                        (3 * mu ** 2 + hw ** 2) ** 2)
    r_var = base_radius ** 2 * ((mu ** 2) / 4 + (5 / 12) * hw ** 2 -
                                (4 / 15) * (hw ** 4) / (3 * mu ** 2 + hw ** 2))
    return _lift_gaussian(d, t_mean, t_var, r_var, diag)


def cast_rays(tdist, origins, directions, radii, ray_shape="cone", diag=True):
    assert ray_shape == "cone"
    t0, t1 = tdist[..., :-1], tdist[..., 1:]
    means, covs = _conical_frustum_to_gaussian(directions, t0, t1, radii, diag)
    means = means + origins[..., None, :]
    return means, covs


def compute_alpha_weights(density, tdist, dirs, opaque_background=False):
    t_delta = tdist[..., 1:] - tdist[..., :-1]
    delta = t_delta * jnp.linalg.norm(dirs[..., None, :], axis=-1)
    density_delta = density * delta
    if opaque_background:
        density_delta = jnp.concatenate(
            [density_delta[..., :-1],
             jnp.full_like(density_delta[..., -1:], jnp.inf)], axis=-1)
    alpha = 1 - jnp.exp(-density_delta)
    trans = jnp.exp(-jnp.concatenate(
        [jnp.zeros_like(density_delta[..., :1]),
         jnp.cumsum(density_delta[..., :-1], axis=-1)], axis=-1))
    weights = alpha * trans
    return weights, alpha, trans


def volumetric_rendering(rgbs, weights, tdist, bg_rgbs, t_far, compute_extras):
    rendering = {}
    acc = weights.sum(axis=-1)
    bg_w = jnp.maximum(0, 1 - acc[..., None])
    rendering["rgb"] = (weights[..., None] * rgbs).sum(axis=-2) + bg_w * bg_rgbs
    # TODO(synk): compute_extras branch (depth/acc extras) omitted; forward passes False.
    return rendering


# ----------------------------------------------------------------------------
# MLP parameters (raw, faithful to torch init) + padding/casting once at setup
# ----------------------------------------------------------------------------
def init_mlp_params(key, *, netdepth, netwidth, pos_size, view_pos_size,
                    disable_rgb, skip_layer=4, skip_layer_dir=4,
                    bottleneck_width=256, netwidth_condition=128,
                    netdepth_condition=1, num_rgb_channels=3,
                    num_density_channels=1, min_deg_point=0, max_deg_point=12,
                    deg_view=4, density_bias=-1.0, rgb_padding=0.001):
    keys = iter(jax.random.split(key, 2 * (netdepth + netdepth_condition) + 16))

    def kaiming_w(k, fan_in, fan_out):
        bound = float(np.sqrt(6.0 / fan_in))
        return jax.random.uniform(k, (fan_in, fan_out), jnp.float32, -bound, bound)

    def default_b(k, fan_in, fan_out):
        bound = float(1.0 / np.sqrt(fan_in))
        return jax.random.uniform(k, (fan_out,), jnp.float32, -bound, bound)

    p = {"pts_w": [], "pts_b": []}
    in_dim = pos_size
    for idx in range(netdepth):
        p["pts_w"].append(kaiming_w(next(keys), in_dim, netwidth))
        p["pts_b"].append(default_b(next(keys), in_dim, netwidth))
        in_dim = netwidth + pos_size if (idx % skip_layer == 0 and idx > 0) else netwidth
    p["dens_w"] = kaiming_w(next(keys), netwidth, num_density_channels)
    p["dens_b"] = default_b(next(keys), netwidth, num_density_channels)
    if not disable_rgb:
        p["bott_w"] = kaiming_w(next(keys), netwidth, bottleneck_width)
        p["bott_b"] = default_b(next(keys), netwidth, bottleneck_width)
        p["view_w"], p["view_b"] = [], []
        vin = bottleneck_width + view_pos_size
        for idx in range(netdepth_condition):
            p["view_w"].append(kaiming_w(next(keys), vin, netwidth_condition))
            p["view_b"].append(default_b(next(keys), vin, netwidth_condition))
            vin = (netwidth_condition + view_pos_size
                   if (idx % skip_layer_dir == 0 and idx > 0) else netwidth_condition)
        p["rgb_w"] = kaiming_w(next(keys), netwidth_condition, num_rgb_channels)
        p["rgb_b"] = default_b(next(keys), netwidth_condition, num_rgb_channels)
    p["config"] = dict(netdepth=netdepth, netwidth=netwidth, skip_layer=skip_layer,
                       skip_layer_dir=skip_layer_dir,
                       netdepth_condition=netdepth_condition,
                       disable_rgb=disable_rgb, min_deg_point=min_deg_point,
                       max_deg_point=max_deg_point, deg_view=deg_view,
                       density_bias=density_bias, rgb_padding=rgb_padding)
    return p


def _pad_weight(w):
    k, n = w.shape
    kp, npad = _round_up(k, 128), _round_up(n, 128)
    return jnp.zeros((kp, npad), jnp.bfloat16).at[:k, :n].set(w.astype(jnp.bfloat16))


def _pad_bias(b):
    n = b.shape[0]
    npad = _round_up(n, 128)
    return jnp.zeros((1, npad), jnp.float32).at[0, :n].set(b.astype(jnp.float32))


def pad_mlp_params(p):
    """Pad + cast weights to bf16 (K,N multiples of 128) ONCE; pre-split
    skip-concat weights along K; fuse the [bottleneck | density] head; split
    the first view layer's K into [bottleneck | dir_enc].  Produces the flat
    argument list consumed by the fused Pallas kernel."""
    cfg = p["config"]
    netdepth, skip_layer = cfg["netdepth"], cfg["skip_layer"]
    netwidth = cfg["netwidth"]
    q = {"config": cfg}
    flat, skip_flags = [], []
    for j in range(netdepth):
        w = p["pts_w"][j]
        has_skip = (j >= 1) and ((j - 1) % skip_layer == 0) and (j - 1 > 0)
        skip_flags.append(has_skip)
        if has_skip:
            flat.append(_pad_weight(w[:netwidth]))      # multiplies h
            flat.append(_pad_weight(w[netwidth:]))      # multiplies skip input x
        else:
            flat.append(_pad_weight(w))
        flat.append(_pad_bias(p["pts_b"][j]))
    # the torch module requires that the last pts layer does not emit a concat
    assert not ((netdepth - 1) % skip_layer == 0 and netdepth - 1 > 0)

    if cfg["disable_rgb"]:
        flat.append(_pad_weight(p["dens_w"]))
        flat.append(_pad_bias(p["dens_b"]))
    else:
        bott_width = int(p["bott_w"].shape[1])
        # head = [bottleneck | density]  (bottleneck first -> lane-aligned slice)
        head_w = jnp.concatenate([p["bott_w"], p["dens_w"]], axis=1)
        head_b = jnp.concatenate([p["bott_b"], p["dens_b"]], axis=0)
        flat.append(_pad_weight(head_w))
        flat.append(_pad_bias(head_b))
        # view layer 0: K split into [bottleneck | dir_enc]
        w0 = p["view_w"][0]
        flat.append(_pad_weight(w0[:bott_width]))
        flat.append(_pad_weight(w0[bott_width:]))
        flat.append(_pad_bias(p["view_b"][0]))
        for j in range(1, cfg["netdepth_condition"]):
            # TODO(synk): view-MLP skip concat (needs netdepth_condition>=5) not supported.
            assert not ((j - 1) % cfg["skip_layer_dir"] == 0 and j - 1 > 0)
            flat.append(_pad_weight(p["view_w"][j]))
            flat.append(_pad_bias(p["view_b"][j]))
        flat.append(_pad_weight(p["rgb_w"]))
        flat.append(_pad_bias(p["rgb_b"]))
        q["bott_width"] = bott_width
        q["n_view_layers"] = int(cfg["netdepth_condition"])
    q["flat"] = tuple(flat)
    q["skip_flags"] = tuple(bool(s) for s in skip_flags)
    return q


# ----------------------------------------------------------------------------
# MLP forward (MipNeRF360MLP / PropMLP / NeRFMLP) — single fused kernel call
# ----------------------------------------------------------------------------
def mlp_forward(p, means, covs, viewdirs, pos_basis_t):
    cfg = p["config"]
    means_c, covs_c = contract_tracked(means, covs)
    lifted_means, lifted_vars = lift_and_diagonalize(means_c, covs_c, pos_basis_t)
    x = integrated_pos_enc(lifted_means, lifted_vars,
                           cfg["min_deg_point"], cfg["max_deg_point"])
    bsz, S, F = x.shape
    m = bsz * S
    x2 = x.reshape(m, F)

    if cfg["disable_rgb"]:
        density = fused_mlp_apply(p, x2, None)
        density = density.reshape(bsz, S)
        return density, jnp.zeros_like(means)

    dir_enc = pos_enc(viewdirs, 0, cfg["deg_view"], append_identity=True)
    dir_enc = jnp.broadcast_to(dir_enc[:, None, :],
                               (bsz, S, dir_enc.shape[-1])).reshape(m, -1)
    density, rgb = fused_mlp_apply(p, x2, dir_enc)
    return density.reshape(bsz, S), rgb.reshape(bsz, S, 3)


# ----------------------------------------------------------------------------
# MipNeRF360 forward
# ----------------------------------------------------------------------------
def mipnerf360_forward(params_levels, pos_basis_t, batch, train_frac,
                       randomized, is_train, near, far, *,
                       num_prop_samples=64, num_nerf_samples=32, num_levels=3,
                       anneal_slope=10.0, dilation_multiplier=0.5,
                       dilation_bias=0.0025, resample_padding=0.0,
                       bg_intensity=1.0, opaque_background=False):
    bsz = batch["rays_o"].shape[0]
    _, s_to_t = construct_ray_warps(near, far)
    init_s_near, init_s_far = 0.0, 1.0  # near_anneal_rate is None
    sdist = jnp.concatenate([jnp.full((bsz, 1), init_s_near, jnp.float32),
                             jnp.full((bsz, 1), init_s_far, jnp.float32)], axis=-1)
    weights = jnp.ones((bsz, 1), jnp.float32)
    prod_num_samples = 1
    renderings, ray_history = [], []
    for i_level in range(num_levels):
        is_prop = i_level < num_levels - 1
        num_samples = num_prop_samples if is_prop else num_nerf_samples
        dilation = dilation_bias + dilation_multiplier * (init_s_far - init_s_near) / prod_num_samples
        prod_num_samples *= num_samples
        use_dilation = dilation_bias > 0 or dilation_multiplier > 0
        if i_level > 0 and use_dilation:
            sdist, weights = max_dilate_weights(sdist, weights, dilation,
                                                domain=(init_s_near, init_s_far),
                                                renormalize=True)
            sdist = sdist[..., 1:-1]
            weights = weights[..., 1:-1]
        if anneal_slope > 0:
            anneal = anneal_slope * train_frac / ((anneal_slope - 1) * train_frac + 1)
        else:
            anneal = 1.0
        logits_resample = jnp.where(sdist[..., 1:] > sdist[..., :-1],
                                    anneal * jnp.log(weights + resample_padding),
                                    -jnp.inf)
        sdist = sample_intervals(randomized, sdist, logits_resample, num_samples,
                                 single_jitter=True,
                                 domain=(init_s_near, init_s_far))
        sdist = jax.lax.stop_gradient(sdist)  # stop_level_grad
        tdist = s_to_t(sdist)
        means, covs = cast_rays(tdist, batch["rays_o"], batch["rays_d"],
                                batch["radii"], "cone", diag=False)
        density, rgb = mlp_forward(params_levels[i_level], means, covs,
                                   batch["viewdirs"], pos_basis_t)
        weights = compute_alpha_weights(density, tdist, batch["rays_d"],
                                        opaque_background=opaque_background)[0]
        bg_rgbs = bg_intensity  # bg_intensity_range == (1.0, 1.0)
        rendering = volumetric_rendering(rgb, weights, tdist, bg_rgbs, far, False)
        ray_history.append({"density": density, "rgb": rgb,
                            "sdist": sdist, "weights": weights})
        renderings.append(rendering)
    return renderings, ray_history


# ----------------------------------------------------------------------------
# main
# ----------------------------------------------------------------------------
if __name__ == "__main__":
    key = jax.random.PRNGKey(0)
    k_rays, k_dirs, kp0, kp1, kp2 = jax.random.split(key, 5)

    bsz = 2
    rays_o = 0.1 * jax.random.normal(k_rays, (bsz, 3), jnp.float32)
    rays_d = jax.random.normal(k_dirs, (bsz, 3), jnp.float32)
    viewdirs = rays_d / jnp.linalg.norm(rays_d, axis=-1, keepdims=True)
    radii = jnp.full((bsz, 1), 0.005, jnp.float32)
    batch = {"rays_o": rays_o, "rays_d": rays_d,
             "viewdirs": viewdirs, "radii": radii}

    basis = generate_basis("icosahedron", 2)                    # (21, 3)
    pos_basis_t = jnp.asarray(basis.T, jnp.float32)             # (3, 21)
    pos_size = (12 - 0) * 2 * pos_basis_t.shape[-1]             # 504
    view_pos_size = (4 * 2 + 1) * 3                             # 27

    raw_params = [
        init_mlp_params(kp0, netdepth=4, netwidth=256, pos_size=pos_size,
                        view_pos_size=view_pos_size, disable_rgb=True),   # PropMLP
        init_mlp_params(kp1, netdepth=4, netwidth=256, pos_size=pos_size,
                        view_pos_size=view_pos_size, disable_rgb=True),   # PropMLP
        init_mlp_params(kp2, netdepth=8, netwidth=1024, pos_size=pos_size,
                        view_pos_size=view_pos_size, disable_rgb=False),  # NeRFMLP
    ]
    # Pad + cast + restructure weights ONCE (bf16 weights, f32 biases).
    params_levels = [pad_mlp_params(p) for p in raw_params]

    renderings, ray_history = mipnerf360_forward(
        params_levels, pos_basis_t, batch,
        train_frac=0.5, randomized=False, is_train=False,
        near=0.5, far=6.0)

    jax.block_until_ready(renderings[-1]["rgb"])
    jax.block_until_ready(ray_history[-1]["weights"])
    print("KERNEL_OK")
</pallas_src>

<mosaic_0001>
module attributes {stable_mosaic.version = 11 : i64} {
  func.func @_fused_mlp_kernel(%arg0: i32, %arg1: memref<128x512xbf16, #tpu.memory_space<vmem>>, %arg2: memref<512x256xbf16, #tpu.memory_space<vmem>>, %arg3: memref<1x256xf32, #tpu.memory_space<vmem>>, %arg4: memref<256x256xbf16, #tpu.memory_space<vmem>>, %arg5: memref<1x256xf32, #tpu.memory_space<vmem>>, %arg6: memref<256x256xbf16, #tpu.memory_space<vmem>>, %arg7: memref<1x256xf32, #tpu.memory_space<vmem>>, %arg8: memref<256x256xbf16, #tpu.memory_space<vmem>>, %arg9: memref<1x256xf32, #tpu.memory_space<vmem>>, %arg10: memref<256x128xbf16, #tpu.memory_space<vmem>>, %arg11: memref<1x128xf32, #tpu.memory_space<vmem>>, %arg12: memref<128x128xf32, #tpu.memory_space<vmem>>) attributes {dimension_semantics = [#tpu.dimension_semantics<parallel>], iteration_bounds = array<i64: 1>, scalar_prefetch = 0 : i64, scratch_operands = 0 : i64, tpu.core_type = #tpu.core_type<tc>, window_params = [{transform_indices = @transform_0, window_bounds = array<i64: 128, 512>}, {pipeline_mode = #tpu.pipeline_mode<synchronous>, transform_indices = @transform_1, window_bounds = array<i64: 512, 256>}, {pipeline_mode = #tpu.pipeline_mode<synchronous>, transform_indices = @transform_2, window_bounds = array<i64: 1, 256>}, {pipeline_mode = #tpu.pipeline_mode<synchronous>, transform_indices = @transform_3, window_bounds = array<i64: 256, 256>}, {pipeline_mode = #tpu.pipeline_mode<synchronous>, transform_indices = @transform_4, window_bounds = array<i64: 1, 256>}, {pipeline_mode = #tpu.pipeline_mode<synchronous>, transform_indices = @transform_5, window_bounds = array<i64: 256, 256>}, {pipeline_mode = #tpu.pipeline_mode<synchronous>, transform_indices = @transform_6, window_bounds = array<i64: 1, 256>}, {pipeline_mode = #tpu.pipeline_mode<synchronous>, transform_indices = @transform_7, window_bounds = array<i64: 256, 256>}, {pipeline_mode = #tpu.pipeline_mode<synchronous>, transform_indices = @transform_8, window_bounds = array<i64: 1, 256>}, {pipeline_mode = #tpu.pipeline_mode<synchronous>, transform_indices = @transform_9, window_bounds = array<i64: 256, 128>}, {pipeline_mode = #tpu.pipeline_mode<synchronous>, transform_indices = @transform_10, window_bounds = array<i64: 1, 128>}, {transform_indices = @transform_11, window_bounds = array<i64: 128, 128>}]} {
    %c0 = arith.constant 0 : index
    %c0_0 = arith.constant 0 : index
    %0 = vector.load %arg1[%c0, %c0_0] : memref<128x512xbf16, #tpu.memory_space<vmem>>, vector<128x512xbf16>
    %c0_1 = arith.constant 0 : index
    %c0_2 = arith.constant 0 : index
    %1 = vector.load %arg2[%c0_1, %c0_2] : memref<512x256xbf16, #tpu.memory_space<vmem>>, vector<512x256xbf16>
    %cst = arith.constant dense<0.000000e+00> : vector<128x256xf32>
    %2 = tpu.matmul %0, %1, %cst {dimension_numbers = #tpu.dot_dimension_numbers<[1], [0], [0], [1], [0, 0, 1, 1], [], []>} : vector<128x512xbf16>, vector<512x256xbf16>, vector<128x256xf32> -> vector<128x256xf32>
    %c0_3 = arith.constant 0 : index
    %c0_4 = arith.constant 0 : index
    %3 = vector.load %arg3[%c0_3, %c0_4] : memref<1x256xf32, #tpu.memory_space<vmem>>, vector<1x256xf32>
    %4 = vector.broadcast %3 : vector<1x256xf32> to vector<128x256xf32>
    %5 = arith.addf %2, %4 : vector<128x256xf32>
    %cst_5 = arith.constant 0.000000e+00 : f32
    %6 = vector.broadcast %cst_5 : f32 to vector<128x256xf32>
    %7 = arith.maximumf %5, %6 : vector<128x256xf32>
    %8 = arith.truncf %7 : vector<128x256xf32> to vector<128x256xbf16>
    %c0_6 = arith.constant 0 : index
    %c0_7 = arith.constant 0 : index
    %9 = vector.load %arg4[%c0_6, %c0_7] : memref<256x256xbf16, #tpu.memory_space<vmem>>, vector<256x256xbf16>
    %cst_8 = arith.constant dense<0.000000e+00> : vector<128x256xf32>
    %10 = tpu.matmul %8, %9, %cst_8 {dimension_numbers = #tpu.dot_dimension_numbers<[1], [0], [0], [1], [0, 0, 1, 1], [], []>} : vector<128x256xbf16>, vector<256x256xbf16>, vector<128x256xf32> -> vector<128x256xf32>
    %c0_9 = arith.constant 0 : index
    %c0_10 = arith.constant 0 : index
    %11 = vector.load %arg5[%c0_9, %c0_10] : memref<1x256xf32, #tpu.memory_space<vmem>>, vector<1x256xf32>
    %12 = vector.broadcast %11 : vector<1x256xf32> to vector<128x256xf32>
    %13 = arith.addf %10, %12 : vector<128x256xf32>
    %cst_11 = arith.constant 0.000000e+00 : f32
    %14 = vector.broadcast %cst_11 : f32 to vector<128x256xf32>
    %15 = arith.maximumf %13, %14 : vector<128x256xf32>
    %16 = arith.truncf %15 : vector<128x256xf32> to vector<128x256xbf16>
    %c0_12 = arith.constant 0 : index
    %c0_13 = arith.constant 0 : index
    %17 = vector.load %arg6[%c0_12, %c0_13] : memref<256x256xbf16, #tpu.memory_space<vmem>>, vector<256x256xbf16>
    %cst_14 = arith.constant dense<0.000000e+00> : vector<128x256xf32>
    %18 = tpu.matmul %16, %17, %cst_14 {dimension_numbers = #tpu.dot_dimension_numbers<[1], [0], [0], [1], [0, 0, 1, 1], [], []>} : vector<128x256xbf16>, vector<256x256xbf16>, vector<128x256xf32> -> vector<128x256xf32>
    %c0_15 = arith.constant 0 : index
    %c0_16 = arith.constant 0 : index
    %19 = vector.load %arg7[%c0_15, %c0_16] : memref<1x256xf32, #tpu.memory_space<vmem>>, vector<1x256xf32>
    %20 = vector.broadcast %19 : vector<1x256xf32> to vector<128x256xf32>
    %21 = arith.addf %18, %20 : vector<128x256xf32>
    %cst_17 = arith.constant 0.000000e+00 : f32
    %22 = vector.broadcast %cst_17 : f32 to vector<128x256xf32>
    %23 = arith.maximumf %21, %22 : vector<128x256xf32>
    %24 = arith.truncf %23 : vector<128x256xf32> to vector<128x256xbf16>
    %c0_18 = arith.constant 0 : index
    %c0_19 = arith.constant 0 : index
    %25 = vector.load %arg8[%c0_18, %c0_19] : memref<256x256xbf16, #tpu.memory_space<vmem>>, vector<256x256xbf16>
    %cst_20 = arith.constant dense<0.000000e+00> : vector<128x256xf32>
    %26 = tpu.matmul %24, %25, %cst_20 {dimension_numbers = #tpu.dot_dimension_numbers<[1], [0], [0], [1], [0, 0, 1, 1], [], []>} : vector<128x256xbf16>, vector<256x256xbf16>, vector<128x256xf32> -> vector<128x256xf32>
    %c0_21 = arith.constant 0 : index
    %c0_22 = arith.constant 0 : index
    %27 = vector.load %arg9[%c0_21, %c0_22] : memref<1x256xf32, #tpu.memory_space<vmem>>, vector<1x256xf32>
    %28 = vector.broadcast %27 : vector<1x256xf32> to vector<128x256xf32>
    %29 = arith.addf %26, %28 : vector<128x256xf32>
    %cst_23 = arith.constant 0.000000e+00 : f32
    %30 = vector.broadcast %cst_23 : f32 to vector<128x256xf32>
    %31 = arith.maximumf %29, %30 : vector<128x256xf32>
    %32 = arith.truncf %31 : vector<128x256xf32> to vector<128x256xbf16>
    %c0_24 = arith.constant 0 : index
    %c0_25 = arith.constant 0 : index
    %33 = vector.load %arg10[%c0_24, %c0_25] : memref<256x128xbf16, #tpu.memory_space<vmem>>, vector<256x128xbf16>
    %cst_26 = arith.constant dense<0.000000e+00> : vector<128x128xf32>
    %34 = tpu.matmul %32, %33, %cst_26 {dimension_numbers = #tpu.dot_dimension_numbers<[1], [0], [0], [1], [0, 0, 1, 1], [], []>} : vector<128x256xbf16>, vector<256x128xbf16>, vector<128x128xf32> -> vector<128x128xf32>
    %c0_27 = arith.constant 0 : index
    %c0_28 = arith.constant 0 : index
    %35 = vector.load %arg11[%c0_27, %c0_28] : memref<1x128xf32, #tpu.memory_space<vmem>>, vector<1x128xf32>
    %36 = vector.broadcast %35 : vector<1x128xf32> to vector<128x128xf32>
    %37 = arith.addf %34, %36 : vector<128x128xf32>
    %cst_29 = arith.constant -1.000000e+00 : f32
    %38 = vector.broadcast %cst_29 : f32 to vector<128x128xf32>
    %39 = arith.addf %37, %38 : vector<128x128xf32>
    %cst_30 = arith.constant 0.000000e+00 : f32
    %40 = vector.broadcast %cst_30 : f32 to vector<128x128xf32>
    %41 = arith.maximumf %39, %40 : vector<128x128xf32>
    %42 = math.absf %39 : vector<128x128xf32>
    %cst_31 = arith.constant 0.000000e+00 : f32
    %43 = vector.broadcast %cst_31 : f32 to vector<128x128xf32>
    %44 = arith.subf %43, %42 : vector<128x128xf32>
    %45 = math.exp %44 : vector<128x128xf32>
    %cst_32 = arith.constant 1.000000e+00 : f32
    %46 = vector.broadcast %cst_32 : f32 to vector<128x128xf32>
    %47 = arith.addf %46, %45 : vector<128x128xf32>
    %48 = math.log %47 : vector<128x128xf32>
    %49 = arith.addf %41, %48 : vector<128x128xf32>
    %c0_33 = arith.constant 0 : index
    %c0_34 = arith.constant 0 : index
    %50 = vector.load %arg12[%c0_33, %c0_34] : memref<128x128xf32, #tpu.memory_space<vmem>>, vector<128x128xf32>
    tpu.vector_store %arg12[%c0_33, %c0_34], %49 {strides = array<i32>} : memref<128x128xf32, #tpu.memory_space<vmem>>, vector<128x128xf32>,
    return
  }
  func.func @transform_0(%arg0: i32) -> (i32, i32) {
    %c0_i32 = arith.constant 0 : i32
    %c0_i32_0 = arith.constant 0 : i32
    return %arg0, %c0_i32 : i32, i32
  }
  func.func @transform_1(%arg0: i32) -> (i32, i32) {
    %c0_i32 = arith.constant 0 : i32
    %c0_i32_0 = arith.constant 0 : i32
    %c0_i32_1 = arith.constant 0 : i32
    return %c0_i32, %c0_i32_0 : i32, i32
  }
  func.func @transform_2(%arg0: i32) -> (i32, i32) {
    %c0_i32 = arith.constant 0 : i32
    %c0_i32_0 = arith.constant 0 : i32
    %c0_i32_1 = arith.constant 0 : i32
    return %c0_i32, %c0_i32_0 : i32, i32
  }
  func.func @transform_3(%arg0: i32) -> (i32, i32) {
    %c0_i32 = arith.constant 0 : i32
    %c0_i32_0 = arith.constant 0 : i32
    %c0_i32_1 = arith.constant 0 : i32
    return %c0_i32, %c0_i32_0 : i32, i32
  }
  func.func @transform_4(%arg0: i32) -> (i32, i32) {
    %c0_i32 = arith.constant 0 : i32
    %c0_i32_0 = arith.constant 0 : i32
    %c0_i32_1 = arith.constant 0 : i32
    return %c0_i32, %c0_i32_0 : i32, i32
  }
  func.func @transform_5(%arg0: i32) -> (i32, i32) {
    %c0_i32 = arith.constant 0 : i32
    %c0_i32_0 = arith.constant 0 : i32
    %c0_i32_1 = arith.constant 0 : i32
    return %c0_i32, %c0_i32_0 : i32, i32
  }
  func.func @transform_6(%arg0: i32) -> (i32, i32) {
    %c0_i32 = arith.constant 0 : i32
    %c0_i32_0 = arith.constant 0 : i32
    %c0_i32_1 = arith.constant 0 : i32
    return %c0_i32, %c0_i32_0 : i32, i32
  }
  func.func @transform_7(%arg0: i32) -> (i32, i32) {
    %c0_i32 = arith.constant 0 : i32
    %c0_i32_0 = arith.constant 0 : i32
    %c0_i32_1 = arith.constant 0 : i32
    return %c0_i32, %c0_i32_0 : i32, i32
  }
  func.func @transform_8(%arg0: i32) -> (i32, i32) {
    %c0_i32 = arith.constant 0 : i32
    %c0_i32_0 = arith.constant 0 : i32
    %c0_i32_1 = arith.constant 0 : i32
    return %c0_i32, %c0_i32_0 : i32, i32
  }
  func.func @transform_9(%arg0: i32) -> (i32, i32) {
    %c0_i32 = arith.constant 0 : i32
    %c0_i32_0 = arith.constant 0 : i32
    %c0_i32_1 = arith.constant 0 : i32
    return %c0_i32, %c0_i32_0 : i32, i32
  }
  func.func @transform_10(%arg0: i32) -> (i32, i32) {
    %c0_i32 = arith.constant 0 : i32
    %c0_i32_0 = arith.constant 0 : i32
    %c0_i32_1 = arith.constant 0 : i32
    return %c0_i32, %c0_i32_0 : i32, i32
  }
  func.func @transform_11(%arg0: i32) -> (i32, i32) {
    %c0_i32 = arith.constant 0 : i32
    %c0_i32_0 = arith.constant 0 : i32
    return %arg0, %c0_i32 : i32, i32
  }
}

</mosaic_0001>

<bundles_post_ra>
// kernel: tpu_custom_call.1
= control target key start
LH: loop header
LB: loop body
LE: loop exit
PB: predicated region body
PF: predicated region fallthrough
CT: control target
= control target key end

     0   :  { %16 = vsyncpa [#allocation3], 0  ;;  %s3673_s0 = inlined_call_operand.hbm [shape: bf16[128,512], index: 0, kind: input, shape index: {}]   ;;  %s3674_s1 = inlined_call_operand.hbm [shape: bf16[512,256], index: 1, kind: input, shape index: {}]   ;;  %s3675_s2 = inlined_call_operand.vmem [shape: f32[1,256], index: 2, kind: input, shape index: {}]   ;;  %s3676_s3 = inlined_call_operand.hbm [shape: bf16[256,256], index: 3, kind: input, shape index: {}]   ;;  %s3677_s4 = inlined_call_operand.vmem [shape: f32[1,256], index: 4, kind: input, shape index: {}]   ;;  %s3678_s5 = inlined_call_operand.hbm [shape: bf16[256,256], index: 5, kind: input, shape index: {}]   ;;  %s3679_s6 = inlined_call_operand.vmem [shape: f32[1,256], index: 6, kind: input, shape index: {}]   ;;  %s3680_s7 = inlined_call_operand.hbm [shape: bf16[256,256], index: 7, kind: input, shape index: {}]   ;;  %s3681_s8 = inlined_call_operand.vmem [shape: f32[1,256], index: 8, kind: input, shape index: {}]   ;;  %s3682_s9 = inlined_call_operand.hbm [shape: bf16[256,128], index: 9, kind: input, shape index: {}]   ;;  %s3683_s10 = inlined_call_operand.vmem [shape: f32[1,128], index: 10, kind: input, shape index: {}]   ;;  %s3684_s11 = inlined_call_operand.hbm [shape: f32[128,128], index: 11, kind: output, shape index: {}]  }
   0x1   :  { %17 = vsyncpa [#allocation6], 0 }
   0x2   :  { %18 = vsyncpa [#allocation9], 0 }
   0x3   :  { %19 = vsyncpa [#allocation12], 0 }
   0x4   :  { %20 = vsyncpa [#allocation4], 0  ;;  %s3311_s17 = smov [#allocation5]  }
   0x5   :  { %s38_s18 = sshll.u32 %s3311_s17, 4  ;;  %s39_s18 = int_to_ptr.vmem [resolvable:$true] %s38_s18 }
   0x6   :  { %s3169_s19 = scalar_lea.vmem %s39_s18, 8192  ;;  %p3174_p1 = scmp.lt.s32.totalorder %s39_s18, %s39_s18 }
   0x7   :  { %p3170_p0 = scmp.ne.s32.totalorder %s39_s18, %s3169_s19  ;;  %p3175_p2 = scmp.lt.s32.totalorder %s3169_s19, %s3169_s19 }
   0x9   :  { %p3176_p3 = por %p3175_p2, %p3174_p1 }
   0xb   :  { %p3177_p4 = pnand %p3176_p3, %p3170_p0 }
   0xd   :  { %3180 = shalt.err (!%p3177_p4)
}
   0xe   :  { %s3312_s20 = smov 128   ;;  %s3313_s21 = smov 8  }
   0xf   :  { %44 = dma.hbm_to_vmem [thread:$0]  %s3674_s1, 8192, %s39_s18, [#allocation6], %s3312_s20, %s3312_s20, %s3313_s21  }
  0x10   :  { %s3314_s24 = smov [#allocation8]   ;;  %s3315_s26 = smov [#allocation2]  }
  0x11   :  { %s66_s25 = sshll.u32 %s3314_s24, 4  ;;  %s26_s27 = sshll.u32 %s3315_s26, 4  ;;  %s67_s25 = int_to_ptr.vmem [resolvable:$true] %s66_s25  ;;  %s27_s27 = int_to_ptr.vmem [resolvable:$true] %s26_s27 }
  0x12   :  { %s3189_s28 = scalar_lea.vmem %s67_s25, 4096  ;;  %p3194_p6 = scmp.lt.s32.totalorder %s67_s25, %s67_s25 }
  0x13   :  { %p3190_p5 = scmp.ne.s32.totalorder %s67_s25, %s3189_s28  ;;  %p3195_p7 = scmp.lt.s32.totalorder %s3189_s28, %s3189_s28 }
  0x15   :  { %p3196_p8 = por %p3195_p7, %p3194_p6 }
  0x17   :  { %p3197_p9 = pnand %p3196_p8, %p3190_p5 }
  0x19   :  { %3200 = shalt.err (!%p3197_p9)
}
  0x1a   :  { %72 = dma.hbm_to_vmem [thread:$0]  %s3678_s5, 4096, %s67_s25, [#allocation9], %s3312_s20, %s3312_s20, %s3313_s21  }
  0x1b   :  { %s3209_s1 = scalar_lea.vmem %s27_s27, 4096  ;;  %p3214_p11 = scmp.lt.s32.totalorder %s27_s27, %s27_s27 }
  0x1c   :  { %p3210_p10 = scmp.ne.s32.totalorder %s27_s27, %s3209_s1  ;;  %p3215_p12 = scmp.lt.s32.totalorder %s3209_s1, %s3209_s1 }
  0x1e   :  { %p3216_p13 = por %p3215_p12, %p3214_p11 }
  0x20   :  { %p3217_p0 = pnand %p3216_p13, %p3210_p10 }
  0x22   :  { %3220 = shalt.err (!%p3217_p0)
}
  0x23   :  { %s3316_s12 = smov 256   ;;  %s3317_s13 = smov 16  }
  0x24   :  { %32 = dma.hbm_to_vmem [thread:$0]  %s3673_s0, 4096, %s27_s27, [#allocation3], %s3316_s12, %s3316_s12, %s3317_s13  }
  0x25   :  { %s3318_s16 = smov [#allocation7]   ;;  %s3319_s18 = smov [#allocation10]  }
  0x26   :  { %s52_s17 = sshll.u32 %s3318_s16, 4  ;;  %s80_s19 = sshll.u32 %s3319_s18, 4  ;;  %s53_s17 = int_to_ptr.vmem [resolvable:$true] %s52_s17  ;;  %s81_s19 = int_to_ptr.vmem [resolvable:$true] %s80_s19 }
  0x27   :  { %s3229_s5 = scalar_lea.vmem %s53_s17, 4096  ;;  %p3234_p2 = scmp.lt.s32.totalorder %s53_s17, %s53_s17 }
  0x28   :  { %p3230_p1 = scmp.ne.s32.totalorder %s53_s17, %s3229_s5  ;;  %p3235_p3 = scmp.lt.s32.totalorder %s3229_s5, %s3229_s5 }
  0x2a   :  { %p3236_p4 = por %p3235_p3, %p3234_p2 }
  0x2c   :  { %p3237_p5 = pnand %p3236_p4, %p3230_p1 }
  0x2e   :  { %3240 = shalt.err (!%p3237_p5)
}
  0x2f   :  { %58 = dma.hbm_to_vmem [thread:$0]  %s3676_s3, 4096, %s53_s17, [#allocation6], %s3312_s20, %s3312_s20, %s3313_s21  }
  0x30   :  { %s3249_s0 = scalar_lea.vmem %s81_s19, 4096  ;;  %p3254_p7 = scmp.lt.s32.totalorder %s81_s19, %s81_s19 }
  0x31   :  { %p3250_p6 = scmp.ne.s32.totalorder %s81_s19, %s3249_s0  ;;  %p3255_p8 = scmp.lt.s32.totalorder %s3249_s0, %s3249_s0 }
  0x33   :  { %p3256_p9 = por %p3255_p8, %p3254_p7 }
  0x35   :  { %p3257_p10 = pnand %p3256_p9, %p3250_p6 }
  0x37   :  { %3260 = shalt.err (!%p3257_p10)
}
  0x38   :  { %86 = dma.hbm_to_vmem [thread:$0]  %s3680_s7, 4096, %s81_s19, [#allocation9], %s3312_s20, %s3312_s20, %s3313_s21  }
  0x39   :  { %s3320_s26 = smov [#allocation11]  }
  0x3a   :  { %s94_s27 = sshll.u32 %s3320_s26, 4  ;;  %s95_s27 = int_to_ptr.vmem [resolvable:$true] %s94_s27 }
  0x3b   :  { %s3269_s28 = scalar_lea.vmem %s95_s27, 2048  ;;  %p3274_p12 = scmp.lt.s32.totalorder %s95_s27, %s95_s27 }
  0x3c   :  { %p3270_p11 = scmp.ne.s32.totalorder %s95_s27, %s3269_s28  ;;  %p3275_p13 = scmp.lt.s32.totalorder %s3269_s28, %s3269_s28 }
  0x3e   :  { %p3276_p0 = por %p3275_p13, %p3274_p12 }
  0x40   :  { %p3277_p1 = pnand %p3276_p0, %p3270_p11 }
  0x42   :  { %3280 = shalt.err (!%p3277_p1)
}
  0x43   :  { %s3321_s3 = smov 64   ;;  %s3322_s29 = smov 4  }
  0x44   :  { %100 = dma.hbm_to_vmem [thread:$0]  %s3682_s9, 2048, %s95_s27, [#allocation12], %s3321_s3, %s3321_s3, %s3322_s29  }
  0x45   :  { %3301 = dma.done.wait [#allocation3], 4096  }
  0x46   :  { %3302 = vsyncadd [#allocation3], 4294963200 }
  0x47   :  { %3303 = dma.done.wait [#allocation6], 12288  }
  0x48   :  { %3304 = vsyncadd [#allocation6], 4294955008 }
  0x49   :  { %3305 = dma.done.wait [#allocation9], 8192  }
  0x4a   :  { %3306 = vsyncadd [#allocation9], 4294959104 }
  0x4b   :  { %3307 = dma.done.wait [#allocation12], 2048  }
  0x4c   :  { %3308 = vsyncadd [#allocation12], 4294965248  ;;  %v2793_v0 = vld [vmem:[#allocation5 + $0x74] ss:$8 sps:$4 sm:$0xff]   ;;  %v2797_v2 = vld [vmem:[#allocation5 + $0x70] ss:$8 sps:$4 sm:$0xff]  }
  0x4d   :  { %v2795_v1 = vld [vmem:[#allocation5 + $0x174] ss:$8 sps:$4 sm:$0xff]   ;;  %710 = vmatprep.subr.bf16.mxu0 %v2793_v0  ;;  %v2798_v3 = vld [vmem:[#allocation5 + $0x170] ss:$8 sps:$4 sm:$0xff]   ;;  %v2799_v4 = vld [vmem:[#allocation5 + $0x64] ss:$8 sps:$4 sm:$0xff]  }
  0x4e   :  { %823 = vmatprep.subr.bf16.mxu1 %v2795_v1  ;;  %711 = vmatpush1.bf16.msra.mxu0 %v2797_v2  ;;  %v2801_v5 = vld [vmem:[#allocation5 + $0x164] ss:$8 sps:$4 sm:$0xff]   ;;  %v2803_v6 = vld [vmem:[#allocation5 + $0x60] ss:$8 sps:$4 sm:$0xff]   ;;  %v2805_v8 = vld [vmem:[#allocation5 + $0x54] ss:$8 sps:$4 sm:$0xff]  }
  0x4f   :  { %824 = vmatpush1.bf16.msra.mxu1 %v2798_v3  ;;  %712 = vmatprep.subr.bf16.mxu0 %v2799_v4  ;;  %v2804_v7 = vld [vmem:[#allocation5 + $0x160] ss:$8 sps:$4 sm:$0xff]   ;;  %v2807_v9 = vld [vmem:[#allocation5 + $0x154] ss:$8 sps:$4 sm:$0xff]   ;;  %v2809_v10 = vld [vmem:[#allocation5 + $0x50] ss:$8 sps:$4 sm:$0xff]  }
  0x50   :  { %825 = vmatprep.subr.bf16.mxu1 %v2801_v5  ;;  %v2810_v11 = vld [vmem:[#allocation5 + $0x150] ss:$8 sps:$4 sm:$0xff]   ;;  %v2811_v12 = vld [vmem:[#allocation5 + $0x44] ss:$8 sps:$4 sm:$0xff]   ;;  %v2815_v14 = vld [vmem:[#allocation5 + $0x40] ss:$8 sps:$4 sm:$0xff]  }
  0x51   :  { %v2813_v13 = vld [vmem:[#allocation5 + $0x144] ss:$8 sps:$4 sm:$0xff]   ;;  %v2816_v15 = vld [vmem:[#allocation5 + $0x140] ss:$8 sps:$4 sm:$0xff]   ;;  %v2817_v16 = vld [vmem:[#allocation5 + $0x34] ss:$8 sps:$4 sm:$0xff]  }
  0x52   :  { %713 = vmatpush1.bf16.msra.mxu0 %v2803_v6  ;;  %v2819_v17 = vld [vmem:[#allocation5 + $0x134] ss:$8 sps:$4 sm:$0xff]   ;;  %v2821_v18 = vld [vmem:[#allocation5 + $0x30] ss:$8 sps:$4 sm:$0xff]   ;;  %v2823_v20 = vld [vmem:[#allocation5 + $0x24] ss:$8 sps:$4 sm:$0xff]  }
  0x53   :  { %826 = vmatpush1.bf16.msra.mxu1 %v2804_v7  ;;  %714 = vmatprep.subr.bf16.mxu0 %v2805_v8  ;;  %v2822_v19 = vld [vmem:[#allocation5 + $0x130] ss:$8 sps:$4 sm:$0xff]   ;;  %v2825_v21 = vld [vmem:[#allocation5 + $0x124] ss:$8 sps:$4 sm:$0xff]   ;;  %v2827_v22 = vld [vmem:[#allocation5 + $0x20] ss:$8 sps:$4 sm:$0xff]  }
  0x54   :  { %827 = vmatprep.subr.bf16.mxu1 %v2807_v9  ;;  %v2828_v23 = vld [vmem:[#allocation5 + $0x120] ss:$8 sps:$4 sm:$0xff]   ;;  %v2829_v24 = vld [vmem:[#allocation5 + $0x14] ss:$8 sps:$4 sm:$0xff]   ;;  %v2833_v26 = vld [vmem:[#allocation5 + $0x10] ss:$8 sps:$4 sm:$0xff]  }
  0x55   :  { %v2831_v25 = vld [vmem:[#allocation5 + $0x114] ss:$8 sps:$4 sm:$0xff]   ;;  %v2834_v27 = vld [vmem:[#allocation5 + $0x110] ss:$8 sps:$4 sm:$0xff]   ;;  %v2835_v28 = vld [vmem:[#allocation5 + $0x4] ss:$8 sps:$4 sm:$0xff]  }
  0x56   :  { %715 = vmatpush1.bf16.msra.mxu0 %v2809_v10  ;;  %v2837_v29 = vld [vmem:[#allocation5 + $0x104] ss:$8 sps:$4 sm:$0xff]   ;;  %v2839_v30 = vld [vmem:[#allocation5] ss:$8 sps:$4 sm:$0xff]   ;;  %v2841_v32 = vld [vmem:[#allocation5 + $0xf4] ss:$8 sps:$4 sm:$0xff]  }
  0x57   :  { %828 = vmatpush1.bf16.msra.mxu1 %v2810_v11  ;;  %716 = vmatprep.subr.bf16.mxu0 %v2811_v12  ;;  %v2840_v31 = vld [vmem:[#allocation5 + $0x100] ss:$8 sps:$4 sm:$0xff]   ;;  %v2843_v33 = vld [vmem:[#allocation5 + $0x1f4] ss:$8 sps:$4 sm:$0xff]   ;;  %v2845_v34 = vld [vmem:[#allocation5 + $0xf0] ss:$8 sps:$4 sm:$0xff]  }
  0x58   :  { %829 = vmatprep.subr.bf16.mxu1 %v2813_v13  ;;  %v2846_v35 = vld [vmem:[#allocation5 + $0x1f0] ss:$8 sps:$4 sm:$0xff]   ;;  %v2847_v36 = vld [vmem:[#allocation5 + $0xe4] ss:$8 sps:$4 sm:$0xff]   ;;  %v2851_v38 = vld [vmem:[#allocation5 + $0xe0] ss:$8 sps:$4 sm:$0xff]  }
  0x59   :  { %v2849_v37 = vld [vmem:[#allocation5 + $0x1e4] ss:$8 sps:$4 sm:$0xff]   ;;  %v2852_v39 = vld [vmem:[#allocation5 + $0x1e0] ss:$8 sps:$4 sm:$0xff]   ;;  %v2853_v40 = vld [vmem:[#allocation5 + $0xd4] ss:$8 sps:$4 sm:$0xff]  }
  0x5a   :  { %717 = vmatpush1.bf16.msra.mxu0 %v2815_v14  ;;  %v2855_v41 = vld [vmem:[#allocation5 + $0x1d4] ss:$8 sps:$4 sm:$0xff]   ;;  %v2857_v42 = vld [vmem:[#allocation5 + $0xd0] ss:$8 sps:$4 sm:$0xff]   ;;  %v2859_v44 = vld [vmem:[#allocation5 + $0xc4] ss:$8 sps:$4 sm:$0xff]  }
  0x5b   :  { %830 = vmatpush1.bf16.msra.mxu1 %v2816_v15  ;;  %718 = vmatprep.subr.bf16.mxu0 %v2817_v16  ;;  %v2858_v43 = vld [vmem:[#allocation5 + $0x1d0] ss:$8 sps:$4 sm:$0xff]   ;;  %v2861_v45 = vld [vmem:[#allocation5 + $0x1c4] ss:$8 sps:$4 sm:$0xff]   ;;  %v2863_v46 = vld [vmem:[#allocation5 + $0xc0] ss:$8 sps:$4 sm:$0xff]  }
  0x5c   :  { %831 = vmatprep.subr.bf16.mxu1 %v2819_v17  ;;  %v2864_v47 = vld [vmem:[#allocation5 + $0x1c0] ss:$8 sps:$4 sm:$0xff]   ;;  %v2865_v48 = vld [vmem:[#allocation5 + $0xb4] ss:$8 sps:$4 sm:$0xff]   ;;  %v2869_v52 = vld [vmem:[#allocation5 + $0xb0] ss:$8 sps:$4 sm:$0xff]  }
  0x5d   :  { %v2891_v49 = vld [vmem:[#allocation2 + $0x4] ss:$16 sps:$4 sm:$0xff]   ;;  %v2894_v51 = vld [vmem:[#allocation2 + $0xc] ss:$16 sps:$4 sm:$0xff]   ;;  %v2870_v53 = vld [vmem:[#allocation5 + $0x1b0] ss:$8 sps:$4 sm:$0xff]  }
  0x5e   :  { %719 = vmatpush1.bf16.msra.mxu0 %v2821_v18  ;;  %v2867_v50 = vld [vmem:[#allocation5 + $0x1b4] ss:$8 sps:$4 sm:$0xff]   ;;  %742 = vmatprep.mubr.bf16.mxu0 %v2891_v49  ;;  %v2871_v54 = vld [vmem:[#allocation5 + $0xa4] ss:$8 sps:$4 sm:$0xff]   ;;  %v2875_v56 = vld [vmem:[#allocation5 + $0xa0] ss:$8 sps:$4 sm:$0xff]  }
  0x5f   :  { %832 = vmatpush1.bf16.msra.mxu1 %v2822_v19  ;;  %720 = vmatprep.subr.bf16.mxu0 %v2823_v20  ;;  %v2873_v55 = vld [vmem:[#allocation5 + $0x1a4] ss:$8 sps:$4 sm:$0xff]   ;;  %v2876_v57 = vld [vmem:[#allocation5 + $0x1a0] ss:$8 sps:$4 sm:$0xff]   ;;  %v2877_v58 = vld [vmem:[#allocation5 + $0x94] ss:$8 sps:$4 sm:$0xff]  }
  0x60   :  { %833 = vmatprep.subr.bf16.mxu1 %v2825_v21  ;;  %855 = vmatprep.mubr.bf16.mxu1 %v2894_v51  ;;  %v2879_v59 = vld [vmem:[#allocation5 + $0x194] ss:$8 sps:$4 sm:$0xff]   ;;  %v2881_v60 = vld [vmem:[#allocation5 + $0x90] ss:$8 sps:$4 sm:$0xff]   ;;  %v2883_v62 = vld [vmem:[#allocation5 + $0x84] ss:$8 sps:$4 sm:$0xff]  }
  0x61   :  { %v2882_v61 = vld [vmem:[#allocation5 + $0x190] ss:$8 sps:$4 sm:$0xff]   ;;  %v2885_v63 = vld [vmem:[#allocation5 + $0x184] ss:$8 sps:$4 sm:$0xff]   ;;  %v2887_v0 = vld [vmem:[#allocation5 + $0x80] ss:$8 sps:$4 sm:$0xff]  }
  0x62   :  { %721 = vmatpush1.bf16.msra.mxu0 %v2827_v22  ;;  %v2888_v1 = vld [vmem:[#allocation5 + $0x180] ss:$8 sps:$4 sm:$0xff]   ;;  %v2895_v4 = vld [vmem:[#allocation2 + $0x24] ss:$16 sps:$4 sm:$0xff]   ;;  %v2897_v5 = vld [vmem:[#allocation2 + $0x2c] ss:$16 sps:$4 sm:$0xff]  }
  0x63   :  { %834 = vmatpush1.bf16.msra.mxu1 %v2828_v23  ;;  %722 = vmatprep.subr.bf16.mxu0 %v2829_v24  ;;  %v2889_v2 = vld [vmem:[#allocation2] ss:$16 sps:$4 sm:$0xff]   ;;  %v2892_v3 = vld [vmem:[#allocation2 + $0x8] ss:$16 sps:$4 sm:$0xff]   ;;  %v2939_v6 = vld [vmem:[#allocation7 + $0x74] ss:$8 sps:$4 sm:$0xff]  }
  0x64   :  { %835 = vmatprep.subr.bf16.mxu1 %v2831_v25  ;;  %v2937_v7 = vld [vmem:[#allocation7 + $0x70] ss:$8 sps:$4 sm:$0xff]   ;;  %v2942_v8 = vld [vmem:[#allocation7 + $0x64] ss:$8 sps:$4 sm:$0xff]   ;;  %v2940_v10 = vld [vmem:[#allocation7 + $0x60] ss:$8 sps:$4 sm:$0xff]  }
  0x65   :  { %v2899_v9 = vld [vmem:[#allocation2 + $0x20] ss:$16 sps:$4 sm:$0xff]   ;;  %v2900_v11 = vld [vmem:[#allocation2 + $0x28] ss:$16 sps:$4 sm:$0xff]   ;;  %v2901_v12 = vld [vmem:[#allocation2 + $0x44] ss:$16 sps:$4 sm:$0xff]  }
  0x66   :  { %723 = vmatpush1.bf16.msra.mxu0 %v2833_v26  ;;  %v2903_v13 = vld [vmem:[#allocation2 + $0x4c] ss:$16 sps:$4 sm:$0xff]   ;;  %v2943_v15 = vld [vmem:[#allocation7 + $0x50] ss:$8 sps:$4 sm:$0xff]   ;;  %v2946_v19 = vld [vmem:[#allocation7 + $0x40] ss:$8 sps:$4 sm:$0xff]  }
  0x67   :  { %836 = vmatpush1.bf16.msra.mxu1 %v2834_v27  ;;  %724 = vmatprep.subr.bf16.mxu0 %v2835_v28  ;;  %v2945_v14 = vld [vmem:[#allocation7 + $0x54] ss:$8 sps:$4 sm:$0xff]   ;;  %v2948_v16 = vld [vmem:[#allocation7 + $0x44] ss:$8 sps:$4 sm:$0xff]   ;;  %v2905_v17 = vld [vmem:[#allocation2 + $0x40] ss:$16 sps:$4 sm:$0xff]  }
  0x68   :  { %837 = vmatprep.subr.bf16.mxu1 %v2837_v29  ;;  %v2906_v18 = vld [vmem:[#allocation2 + $0x48] ss:$16 sps:$4 sm:$0xff]   ;;  %v2907_v20 = vld [vmem:[#allocation2 + $0x64] ss:$16 sps:$4 sm:$0xff]   ;;  %v2909_v21 = vld [vmem:[#allocation2 + $0x6c] ss:$16 sps:$4 sm:$0xff]  }
  0x69   :  { %v2949_v22 = vld [vmem:[#allocation7 + $0x30] ss:$8 sps:$4 sm:$0xff]   ;;  %v2951_v23 = vld [vmem:[#allocation7 + $0x34] ss:$8 sps:$4 sm:$0xff]   ;;  %v2954_v24 = vld [vmem:[#allocation7 + $0x24] ss:$8 sps:$4 sm:$0xff]  }
  0x6a   :  { %725 = vmatpush1.bf16.msra.mxu0 %v2839_v30  ;;  %v2952_v25 = vld [vmem:[#allocation7 + $0x20] ss:$8 sps:$4 sm:$0xff]   ;;  %v2913_v28 = vld [vmem:[#allocation2 + $0x84] ss:$16 sps:$4 sm:$0xff]   ;;  %v2915_v29 = vld [vmem:[#allocation2 + $0x8c] ss:$16 sps:$4 sm:$0xff]  }
  0x6b   :  { %838 = vmatpush1.bf16.msra.mxu1 %v2840_v31  ;;  %726 = vmatprep.subr.bf16.mxu0 %v2841_v32  ;;  %v2911_v26 = vld [vmem:[#allocation2 + $0x60] ss:$16 sps:$4 sm:$0xff]   ;;  %v2912_v27 = vld [vmem:[#allocation2 + $0x68] ss:$16 sps:$4 sm:$0xff]   ;;  %v2957_v30 = vld [vmem:[#allocation7 + $0x14] ss:$8 sps:$4 sm:$0xff]  }
  0x6c   :  { %839 = vmatprep.subr.bf16.mxu1 %v2843_v33  ;;  %v2955_v31 = vld [vmem:[#allocation7 + $0x10] ss:$8 sps:$4 sm:$0xff]   ;;  %v2960_v32 = vld [vmem:[#allocation7 + $0x4] ss:$8 sps:$4 sm:$0xff]   ;;  %v2958_v33 = vld [vmem:[#allocation7] ss:$8 sps:$4 sm:$0xff]  }
  0x6d   :  { %v2970_v49 = vld [vmem:[#allocation7 + $0xc0] ss:$8 sps:$4 sm:$0xff]  }
  0x6e   :  { %727 = vmatpush2.bf16.msra.mxu0 %v2845_v34  ;;  %v2917_v34 = vld [vmem:[#allocation2 + $0x80] ss:$16 sps:$4 sm:$0xff]   ;;  %v2930_v51 = vld [vmem:[#allocation2 + $0xc8] ss:$16 sps:$4 sm:$0xff]  }
  0x6f   :  { %840 = vmatpush2.bf16.msra.mxu1 %v2846_v35  ;;  %728 = vmatprep.subr.bf16.mxu0 %v2847_v36  ;;  %v2918_v35 = vld [vmem:[#allocation2 + $0x88] ss:$16 sps:$4 sm:$0xff]   ;;  %v2919_v36 = vld [vmem:[#allocation2 + $0xa4] ss:$16 sps:$4 sm:$0xff]  }
  0x70   :  { %841 = vmatprep.subr.bf16.mxu1 %v2849_v37  ;;  %v2921_v37 = vld [vmem:[#allocation2 + $0xac] ss:$16 sps:$4 sm:$0xff]  }
  0x72   :  { %729 = vmatpush2.bf16.msra.mxu0 %v2851_v38  ;;  %v2963_v38 = vld [vmem:[#allocation7 + $0xf4] ss:$8 sps:$4 sm:$0xff]  }
  0x73   :  { %842 = vmatpush2.bf16.msra.mxu1 %v2852_v39  ;;  %730 = vmatprep.subr.bf16.mxu0 %v2853_v40  ;;  %v2961_v39 = vld [vmem:[#allocation7 + $0xf0] ss:$8 sps:$4 sm:$0xff]   ;;  %v2966_v40 = vld [vmem:[#allocation7 + $0xe4] ss:$8 sps:$4 sm:$0xff]  }
  0x74   :  { %843 = vmatprep.subr.bf16.mxu1 %v2855_v41  ;;  %v2964_v41 = vld [vmem:[#allocation7 + $0xe0] ss:$8 sps:$4 sm:$0xff]  }
  0x76   :  { %731 = vmatpush2.bf16.msra.mxu0 %v2857_v42  ;;  %v2923_v42 = vld [vmem:[#allocation2 + $0xa0] ss:$16 sps:$4 sm:$0xff]  }
  0x77   :  { %844 = vmatpush2.bf16.msra.mxu1 %v2858_v43  ;;  %732 = vmatprep.subr.bf16.mxu0 %v2859_v44  ;;  %v2924_v43 = vld [vmem:[#allocation2 + $0xa8] ss:$16 sps:$4 sm:$0xff]   ;;  %v2925_v44 = vld [vmem:[#allocation2 + $0xc4] ss:$16 sps:$4 sm:$0xff]  }
  0x78   :  { %845 = vmatprep.subr.bf16.mxu1 %v2861_v45  ;;  %v2927_v45 = vld [vmem:[#allocation2 + $0xcc] ss:$16 sps:$4 sm:$0xff]  }
  0x7a   :  { %733 = vmatpush2.bf16.msra.mxu0 %v2863_v46  ;;  %v2969_v46 = vld [vmem:[#allocation7 + $0xd4] ss:$8 sps:$4 sm:$0xff]  }
  0x7b   :  { %846 = vmatpush2.bf16.msra.mxu1 %v2864_v47  ;;  %734 = vmatprep.subr.bf16.mxu0 %v2865_v48  ;;  %v2967_v47 = vld [vmem:[#allocation7 + $0xd0] ss:$8 sps:$4 sm:$0xff]   ;;  %v2972_v48 = vld [vmem:[#allocation7 + $0xc4] ss:$8 sps:$4 sm:$0xff]  }
  0x7c   :  { %847 = vmatprep.subr.bf16.mxu1 %v2867_v50  ;;  %v2929_v50 = vld [vmem:[#allocation2 + $0xc0] ss:$16 sps:$4 sm:$0xff]  }
  0x7e   :  { %735 = vmatpush2.bf16.msra.mxu0 %v2869_v52  ;;  %v2931_v52 = vld [vmem:[#allocation2 + $0xe4] ss:$16 sps:$4 sm:$0xff]  }
  0x7f   :  { %848 = vmatpush2.bf16.msra.mxu1 %v2870_v53  ;;  %736 = vmatprep.subr.bf16.mxu0 %v2871_v54  ;;  %v2933_v53 = vld [vmem:[#allocation2 + $0xec] ss:$16 sps:$4 sm:$0xff]  }
  0x80   :  { %849 = vmatprep.subr.bf16.mxu1 %v2873_v55  ;;  %v2975_v54 = vld [vmem:[#allocation7 + $0xb4] ss:$8 sps:$4 sm:$0xff]   ;;  %v2973_v55 = vld [vmem:[#allocation7 + $0xb0] ss:$8 sps:$4 sm:$0xff]  }
  0x82   :  { %737 = vmatpush2.bf16.msra.mxu0 %v2875_v56  ;;  %v2935_v56 = vld [vmem:[#allocation2 + $0xe0] ss:$16 sps:$4 sm:$0xff]  }
  0x83   :  { %850 = vmatpush2.bf16.msra.mxu1 %v2876_v57  ;;  %738 = vmatprep.subr.bf16.mxu0 %v2877_v58  ;;  %v2936_v57 = vld [vmem:[#allocation2 + $0xe8] ss:$16 sps:$4 sm:$0xff]   ;;  %v2978_v58 = vld [vmem:[#allocation7 + $0xa4] ss:$8 sps:$4 sm:$0xff]  }
  0x84   :  { %851 = vmatprep.subr.bf16.mxu1 %v2879_v59  ;;  %v2976_v59 = vld [vmem:[#allocation7 + $0xa0] ss:$8 sps:$4 sm:$0xff]  }
  0x86   :  { %739 = vmatpush2.bf16.msra.mxu0 %v2881_v60  ;;  %v2981_v60 = vld [vmem:[#allocation7 + $0x94] ss:$8 sps:$4 sm:$0xff]  }
  0x87   :  { %852 = vmatpush2.bf16.msra.mxu1 %v2882_v61  ;;  %740 = vmatprep.subr.bf16.mxu0 %v2883_v62  ;;  %v2979_v61 = vld [vmem:[#allocation7 + $0x90] ss:$8 sps:$4 sm:$0xff]   ;;  %v2984_v62 = vld [vmem:[#allocation7 + $0x84] ss:$8 sps:$4 sm:$0xff]  }
  0x88   :  { %853 = vmatprep.subr.bf16.mxu1 %v2885_v63  ;;  %v2982_v63 = vld [vmem:[#allocation7 + $0x80] ss:$8 sps:$4 sm:$0xff]  }
  0x8a   :  { %741 = vmatpush2.bf16.msra.mxu0 %v2887_v0  ;;  %v2985_v0 = vld [vmem:[#allocation8 + $0x70] ss:$8 sps:$4 sm:$0xff]  }
  0x8b   :  { %854 = vmatpush2.bf16.msra.mxu1 %v2888_v1  ;;  %1188 = vmatprep.subr.bf16.mxu0 %v2939_v6  ;;  %v2987_v1 = vld [vmem:[#allocation8 + $0x74] ss:$8 sps:$4 sm:$0xff]   ;;  %v2996_v6 = vld [vmem:[#allocation8 + $0x44] ss:$8 sps:$4 sm:$0xff]  }
  0x8c   :  { %1553 = vmatprep.subr.bf16.mxu1 %v2987_v1 }
  0x8d   :  { %743 = vmatmul.mubr.bf16.vlgmr.msra.gmra.mxu0 %v2889_v2  ;;  %v2990_v2 = vld [vmem:[#allocation8 + $0x64] ss:$8 sps:$4 sm:$0xff]  }
  0x8e   :  { %856 = vmatmul.mubr.bf16.vlgmr.msra.gmra.mxu1 %v2892_v3  ;;  %752 = vmatprep.mubr.bf16.mxu0 %v2895_v4  ;;  %v2988_v3 = vld [vmem:[#allocation8 + $0x60] ss:$8 sps:$4 sm:$0xff]   ;;  %v2993_v4 = vld [vmem:[#allocation8 + $0x54] ss:$8 sps:$4 sm:$0xff]  }
  0x8f   :  { %865 = vmatprep.mubr.bf16.mxu1 %v2897_v5  ;;  %1189 = vmatpush1.bf16.msra.mxu0 %v2937_v7  ;;  %v2991_v5 = vld [vmem:[#allocation8 + $0x50] ss:$8 sps:$4 sm:$0xff]   ;;  %v2994_v7 = vld [vmem:[#allocation8 + $0x40] ss:$8 sps:$4 sm:$0xff]  }
  0x90   :  { %1190 = vmatprep.subr.bf16.mxu0 %v2942_v8  ;;  %1554 = vmatpush1.bf16.msra.mxu1 %v2985_v0  ;;  %v2999_v8 = vld [vmem:[#allocation8 + $0x34] ss:$8 sps:$4 sm:$0xff]  }
  0x91   :  { %1555 = vmatprep.subr.bf16.mxu1 %v2990_v2 }
  0x93   :  { %1191 = vmatpush1.bf16.msra.mxu0 %v2940_v10  ;;  %v3002_v10 = vld [vmem:[#allocation8 + $0x24] ss:$8 sps:$4 sm:$0xff]  }
  0x94   :  { %1192 = vmatprep.subr.bf16.mxu0 %v2945_v14  ;;  %1556 = vmatpush1.bf16.msra.mxu1 %v2988_v3  ;;  %v3008_v14 = vld [vmem:[#allocation8 + $0x4] ss:$8 sps:$4 sm:$0xff]  }
  0x95   :  { %753 = vmatmul.mubr.bf16.gmra.mxu0 %v2899_v9  ;;  %1557 = vmatprep.subr.bf16.mxu1 %v2993_v4  ;;  %v2997_v9 = vld [vmem:[#allocation8 + $0x30] ss:$8 sps:$4 sm:$0xff]  }
  0x96   :  { %866 = vmatmul.mubr.bf16.gmra.mxu1 %v2900_v11  ;;  %762 = vmatprep.mubr.bf16.mxu0 %v2901_v12  ;;  %v3000_v11 = vld [vmem:[#allocation8 + $0x20] ss:$8 sps:$4 sm:$0xff]   ;;  %v3005_v12 = vld [vmem:[#allocation8 + $0x14] ss:$8 sps:$4 sm:$0xff]  }
  0x97   :  { %875 = vmatprep.mubr.bf16.mxu1 %v2903_v13  ;;  %1193 = vmatpush1.bf16.msra.mxu0 %v2943_v15  ;;  %v3003_v13 = vld [vmem:[#allocation8 + $0x10] ss:$8 sps:$4 sm:$0xff]   ;;  %v3006_v15 = vld [vmem:[#allocation8] ss:$8 sps:$4 sm:$0xff]  }
  0x98   :  { %1194 = vmatprep.subr.bf16.mxu0 %v2948_v16  ;;  %1558 = vmatpush1.bf16.msra.mxu1 %v2991_v5  ;;  %v3011_v16 = vld [vmem:[#allocation8 + $0xf4] ss:$8 sps:$4 sm:$0xff]  }
  0x99   :  { %1559 = vmatprep.subr.bf16.mxu1 %v2996_v6 }
  0x9b   :  { %1195 = vmatpush1.bf16.msra.mxu0 %v2946_v19  ;;  %v3012_v19 = vld [vmem:[#allocation8 + $0xe0] ss:$8 sps:$4 sm:$0xff]  }
  0x9c   :  { %1196 = vmatprep.subr.bf16.mxu0 %v2951_v23  ;;  %1560 = vmatpush1.bf16.msra.mxu1 %v2994_v7  ;;  %v3018_v23 = vld [vmem:[#allocation8 + $0xc0] ss:$8 sps:$4 sm:$0xff]  }
  0x9d   :  { %763 = vmatmul.mubr.bf16.gmra.mxu0 %v2905_v17  ;;  %1561 = vmatprep.subr.bf16.mxu1 %v2999_v8  ;;  %v3009_v17 = vld [vmem:[#allocation8 + $0xf0] ss:$8 sps:$4 sm:$0xff]  }
  0x9e   :  { %876 = vmatmul.mubr.bf16.gmra.mxu1 %v2906_v18  ;;  %772 = vmatprep.mubr.bf16.mxu0 %v2907_v20  ;;  %v3014_v18 = vld [vmem:[#allocation8 + $0xe4] ss:$8 sps:$4 sm:$0xff]   ;;  %v3017_v20 = vld [vmem:[#allocation8 + $0xd4] ss:$8 sps:$4 sm:$0xff]  }
  0x9f   :  { %885 = vmatprep.mubr.bf16.mxu1 %v2909_v21  ;;  %1197 = vmatpush1.bf16.msra.mxu0 %v2949_v22  ;;  %v3015_v21 = vld [vmem:[#allocation8 + $0xd0] ss:$8 sps:$4 sm:$0xff]   ;;  %v3020_v22 = vld [vmem:[#allocation8 + $0xc4] ss:$8 sps:$4 sm:$0xff]  }
  0xa0   :  { %1198 = vmatprep.subr.bf16.mxu0 %v2954_v24  ;;  %1562 = vmatpush1.bf16.msra.mxu1 %v2997_v9  ;;  %v220_v24 = vlaneseq }
  0xa1   :  { %1563 = vmatprep.subr.bf16.mxu1 %v3002_v10 }
  0xa3   :  { %1199 = vmatpush1.bf16.msra.mxu0 %v2952_v25  ;;  %v3023_v25 = vld [vmem:[#allocation8 + $0xb4] ss:$8 sps:$4 sm:$0xff]  }
  0xa4   :  { %1200 = vmatprep.subr.bf16.mxu0 %v2957_v30  ;;  %1564 = vmatpush1.bf16.msra.mxu1 %v3000_v11  ;;  %v218_v30 = vld [vmem:[%s3675_s2] sm:$0x3] }
  0xa5   :  { %773 = vmatmul.mubr.bf16.gmra.mxu0 %v2911_v26  ;;  %1565 = vmatprep.subr.bf16.mxu1 %v3005_v12  ;;  %v3021_v26 = vld [vmem:[#allocation8 + $0xb0] ss:$8 sps:$4 sm:$0xff]  }
  0xa6   :  { %886 = vmatmul.mubr.bf16.gmra.mxu1 %v2912_v27  ;;  %782 = vmatprep.mubr.bf16.mxu0 %v2913_v28  ;;  %v221_v27 = vshrl.u32 %v220_v24, 7 }
  0xa7   :  { %895 = vmatprep.mubr.bf16.mxu1 %v2915_v29  ;;  %1201 = vmatpush1.bf16.msra.mxu0 %v2955_v31 }
  0xa8   :  { %1202 = vmatprep.subr.bf16.mxu0 %v2960_v32  ;;  %1566 = vmatpush1.bf16.msra.mxu1 %v3003_v13  ;;  %v3414_v28 = vsub.s32 1, %v221_v27  ;;  %v3416_v29 = vsub.s32 0, %v221_v27 }
  0xa9   :  { %1567 = vmatprep.subr.bf16.mxu1 %v3008_v14 }
  0xaa   :  { %v3422_v31 = vrot.slane %v218_v30, %v3414_v28  ;;  %v3425_v32 = vrot.slane %v218_v30, %v3416_v29 }
  0xab   :  { %1203 = vmatpush1.bf16.msra.mxu0 %v2958_v33 }
  0xac   :  { %1204 = vmatprep.subr.bf16.mxu0 %v2963_v38  ;;  %1568 = vmatpush1.bf16.msra.mxu1 %v3006_v15 }
  0xad   :  { %783 = vmatmul.mubr.bf16.gmra.mxu0 %v2917_v34  ;;  %1569 = vmatprep.subr.bf16.mxu1 %v3011_v16 }
  0xae   :  { %896 = vmatmul.mubr.bf16.gmra.mxu1 %v2918_v35  ;;  %792 = vmatprep.mubr.bf16.mxu0 %v2919_v36 }
  0xaf   :  { %905 = vmatprep.mubr.bf16.mxu1 %v2921_v37  ;;  %1205 = vmatpush2.bf16.msra.mxu0 %v2961_v39 }
  0xb0   :  { %1206 = vmatprep.subr.bf16.mxu0 %v2966_v40  ;;  %1570 = vmatpush2.bf16.msra.mxu1 %v3009_v17 }
  0xb1   :  { %1571 = vmatprep.subr.bf16.mxu1 %v3014_v18 }
  0xb3   :  { %1207 = vmatpush2.bf16.msra.mxu0 %v2964_v41 }
  0xb4   :  { %1208 = vmatprep.subr.bf16.mxu0 %v2969_v46  ;;  %1572 = vmatpush2.bf16.msra.mxu1 %v3012_v19 }
  0xb5   :  { %793 = vmatmul.mubr.bf16.gmra.mxu0 %v2923_v42  ;;  %1573 = vmatprep.subr.bf16.mxu1 %v3017_v20 }
  0xb6   :  { %906 = vmatmul.mubr.bf16.gmra.mxu1 %v2924_v43  ;;  %802 = vmatprep.mubr.bf16.mxu0 %v2925_v44 }
  0xb7   :  { %915 = vmatprep.mubr.bf16.mxu1 %v2927_v45  ;;  %1209 = vmatpush2.bf16.msra.mxu0 %v2967_v47 }
  0xb8   :  { %1210 = vmatprep.subr.bf16.mxu0 %v2972_v48  ;;  %1574 = vmatpush2.bf16.msra.mxu1 %v3015_v21 }
  0xb9   :  { %1575 = vmatprep.subr.bf16.mxu1 %v3020_v22 }
  0xbb   :  { %1211 = vmatpush2.bf16.msra.mxu0 %v2970_v49 }
  0xbc   :  { %1212 = vmatprep.subr.bf16.mxu0 %v2975_v54  ;;  %1576 = vmatpush2.bf16.msra.mxu1 %v3018_v23 }
  0xbd   :  { %803 = vmatmul.mubr.bf16.gmra.mxu0 %v2929_v50  ;;  %1577 = vmatprep.subr.bf16.mxu1 %v3023_v25 }
  0xbe   :  { %916 = vmatmul.mubr.bf16.gmra.mxu1 %v2930_v51  ;;  %812 = vmatprep.mubr.bf16.mxu0 %v2931_v52 }
  0xbf   :  { %925 = vmatprep.mubr.bf16.mxu1 %v2933_v53  ;;  %1213 = vmatpush2.bf16.msra.mxu0 %v2973_v55 }
  0xc0   :  { %1214 = vmatprep.subr.bf16.mxu0 %v2978_v58  ;;  %1578 = vmatpush2.bf16.msra.mxu1 %v3021_v26 }
  0xc3   :  { %1215 = vmatpush2.bf16.msra.mxu0 %v2976_v59 }
  0xc4   :  { %1216 = vmatprep.subr.bf16.mxu0 %v2981_v60 }
  0xc5   :  { %813 = vmatmul.mubr.bf16.gmra.mxu0 %v2935_v56 }
  0xc6   :  { %926 = vmatmul.mubr.bf16.gmra.mxu1 %v2936_v57 }
  0xc7   :  { %1217 = vmatpush2.bf16.msra.mxu0 %v2979_v61 }
  0xc8   :  { %1218 = vmatprep.subr.bf16.mxu0 %v2984_v62 }
  0xcb   :  { %1219 = vmatpush2.bf16.msra.mxu0 %v2982_v63 }
 0x14d   :  { %v744_v33 = vpop.f32.mrf.mxu0 }
 0x14e   :  { %v857_v34 = vpop.f32.mrf.mxu1  ;;  %v745_v38 = vadd.f32 %v744_v33, %v3425_v32 }
 0x14f   :  { %v746_v35 = vpop.f32.mrf.mxu0 }
 0x150   :  { %v859_v36 = vpop.f32.mrf.mxu1  ;;  %v747_v37 = vadd.f32 %v746_v35, %v3422_v31  ;;  %v858_v47 = vadd.f32 %v857_v34, %v745_v38 }
 0x151   :  { %v748_v39 = vpop.f32.mrf.mxu0 }
 0x152   :  { %v861_v40 = vpop.f32.mrf.mxu1  ;;  %v749_v41 = vadd.f32 %v748_v39, %v3425_v32  ;;  %v860_v44 = vadd.f32 %v859_v36, %v747_v37  ;;  %v936_v57 = vmax.f32 %v858_v47, 0.0 }
 0x153   :  { %v750_v42 = vpop.f32.mrf.mxu0 }
 0x154   :  { %v863_v43 = vpop.f32.mrf.mxu1  ;;  %v862_v45 = vadd.f32 %v861_v40, %v749_v41  ;;  %v751_v46 = vadd.f32 %v750_v42, %v3422_v31  ;;  %v937_v54 = vmax.f32 %v860_v44, 0.0 }
 0x155   :  { %v754_v48 = vpop.f32.mrf.mxu0 }
 0x156   :  { %v867_v49 = vpop.f32.mrf.mxu1  ;;  %v864_v50 = vadd.f32 %v863_v43, %v751_v46  ;;  %v938_v51 = vmax.f32 %v862_v45, 0.0  ;;  %v755_v58 = vadd.f32 %v754_v48, %v3425_v32 }
 0x157   :  { %v756_v52 = vpop.f32.mrf.mxu0 }
 0x158   :  { %v869_v53 = vpop.f32.mrf.mxu1  ;;  %v939_v55 = vmax.f32 %v864_v50, 0.0  ;;  %v757_v56 = vadd.f32 %v756_v52, %v3422_v31  ;;  %v968_v63 = vpack.c.bf16 %v938_v51, %v936_v57  ;;  %v868_v5 = vadd.f32 %v867_v49, %v755_v58 }
 0x159   :  { %v758_v59 = vpop.f32.mrf.mxu0 }
 0x15a   :  { %v871_v60 = vpop.f32.mrf.mxu1  ;;  %v969_v61 = vpack.c.bf16 %v939_v55, %v937_v54  ;;  %v759_v62 = vadd.f32 %v758_v59, %v3425_v32  ;;  %v870_v2 = vadd.f32 %v869_v53, %v757_v56  ;;  %v940_v15 = vmax.f32 %v868_v5, 0.0 }
 0x15b   :  { %v760_v0 = vpop.f32.mrf.mxu0 }
 0x15c   :  { %v873_v1 = vpop.f32.mrf.mxu1  ;;  %v872_v3 = vadd.f32 %v871_v60, %v759_v62  ;;  %v761_v4 = vadd.f32 %v760_v0, %v3422_v31  ;;  %1220 = vmatprep.mubr.bf16.mxu0 %v969_v61  ;;  %v941_v12 = vmax.f32 %v870_v2, 0.0 }
 0x15d   :  { %v764_v6 = vpop.f32.mrf.mxu0  ;;  %1221 = vmatmul.mubr.bf16.vlgmr.msra.gmra.mxu0 %v968_v63 }
 0x15e   :  { %v877_v7 = vpop.f32.mrf.mxu1  ;;  %v874_v8 = vadd.f32 %v873_v1, %v761_v4  ;;  %v942_v9 = vmax.f32 %v872_v3, 0.0  ;;  %v765_v16 = vadd.f32 %v764_v6, %v3425_v32 }
 0x15f   :  { %v766_v10 = vpop.f32.mrf.mxu0 }
 0x160   :  { %v879_v11 = vpop.f32.mrf.mxu1  ;;  %v943_v13 = vmax.f32 %v874_v8, 0.0  ;;  %v767_v14 = vadd.f32 %v766_v10, %v3422_v31  ;;  %v970_v21 = vpack.c.bf16 %v942_v9, %v940_v15  ;;  %v878_v27 = vadd.f32 %v877_v7, %v765_v16 }
 0x161   :  { %v768_v17 = vpop.f32.mrf.mxu0 }
 0x162   :  { %v881_v18 = vpop.f32.mrf.mxu1  ;;  %v971_v19 = vpack.c.bf16 %v943_v13, %v941_v12  ;;  %v769_v20 = vadd.f32 %v768_v17, %v3425_v32  ;;  %v880_v24 = vadd.f32 %v879_v11, %v767_v14  ;;  %v944_v41 = vmax.f32 %v878_v27, 0.0 }
 0x163   :  { %v770_v22 = vpop.f32.mrf.mxu0 }
 0x164   :  { %v883_v23 = vpop.f32.mrf.mxu1  ;;  %v882_v25 = vadd.f32 %v881_v18, %v769_v20  ;;  %v771_v26 = vadd.f32 %v770_v22, %v3422_v31  ;;  %1230 = vmatprep.mubr.bf16.mxu0 %v971_v19  ;;  %v945_v38 = vmax.f32 %v880_v24, 0.0 }
 0x165   :  { %v774_v30 = vpop.f32.mrf.mxu0  ;;  %1231 = vmatmul.mubr.bf16.gmra.mxu0 %v970_v21 }
 0x166   :  { %v887_v33 = vpop.f32.mrf.mxu1  ;;  %v884_v34 = vadd.f32 %v883_v23, %v771_v26  ;;  %v946_v35 = vmax.f32 %v882_v25, 0.0  ;;  %v775_v42 = vadd.f32 %v774_v30, %v3425_v32 }
 0x167   :  { %v776_v36 = vpop.f32.mrf.mxu0 }
 0x168   :  { %v889_v37 = vpop.f32.mrf.mxu1  ;;  %v947_v39 = vmax.f32 %v884_v34, 0.0  ;;  %v777_v40 = vadd.f32 %v776_v36, %v3422_v31  ;;  %v972_v47 = vpack.c.bf16 %v946_v35, %v944_v41  ;;  %v888_v53 = vadd.f32 %v887_v33, %v775_v42 }
 0x169   :  { %v778_v43 = vpop.f32.mrf.mxu0 }
 0x16a   :  { %v891_v44 = vpop.f32.mrf.mxu1  ;;  %v973_v45 = vpack.c.bf16 %v947_v39, %v945_v38  ;;  %v779_v46 = vadd.f32 %v778_v43, %v3425_v32  ;;  %v890_v50 = vadd.f32 %v889_v37, %v777_v40  ;;  %v948_v63 = vmax.f32 %v888_v53, 0.0 }
 0x16b   :  { %v780_v48 = vpop.f32.mrf.mxu0 }
 0x16c   :  { %v893_v49 = vpop.f32.mrf.mxu1  ;;  %v892_v51 = vadd.f32 %v891_v44, %v779_v46  ;;  %v781_v52 = vadd.f32 %v780_v48, %v3422_v31  ;;  %1240 = vmatprep.mubr.bf16.mxu0 %v973_v45  ;;  %v949_v60 = vmax.f32 %v890_v50, 0.0 }
 0x16d   :  { %v784_v54 = vpop.f32.mrf.mxu0  ;;  %1241 = vmatmul.mubr.bf16.gmra.mxu0 %v972_v47 }
 0x16e   :  { %v897_v55 = vpop.f32.mrf.mxu1  ;;  %v894_v56 = vadd.f32 %v893_v49, %v781_v52  ;;  %v950_v57 = vmax.f32 %v892_v51, 0.0  ;;  %v785_v0 = vadd.f32 %v784_v54, %v3425_v32 }
 0x16f   :  { %v786_v58 = vpop.f32.mrf.mxu0 }
 0x170   :  { %v899_v59 = vpop.f32.mrf.mxu1  ;;  %v951_v61 = vmax.f32 %v894_v56, 0.0  ;;  %v787_v62 = vadd.f32 %v786_v58, %v3422_v31  ;;  %v974_v5 = vpack.c.bf16 %v950_v57, %v948_v63  ;;  %v898_v11 = vadd.f32 %v897_v55, %v785_v0 }
 0x171   :  { %v788_v1 = vpop.f32.mrf.mxu0 }
 0x172   :  { %v901_v2 = vpop.f32.mrf.mxu1  ;;  %v975_v3 = vpack.c.bf16 %v951_v61, %v949_v60  ;;  %v789_v4 = vadd.f32 %v788_v1, %v3425_v32  ;;  %v900_v8 = vadd.f32 %v899_v59, %v787_v62  ;;  %v952_v21 = vmax.f32 %v898_v11, 0.0 }
 0x173   :  { %v790_v6 = vpop.f32.mrf.mxu0 }
 0x174   :  { %v903_v7 = vpop.f32.mrf.mxu1  ;;  %v902_v9 = vadd.f32 %v901_v2, %v789_v4  ;;  %v791_v10 = vadd.f32 %v790_v6, %v3422_v31  ;;  %1250 = vmatprep.mubr.bf16.mxu0 %v975_v3  ;;  %v953_v18 = vmax.f32 %v900_v8, 0.0 }
 0x175   :  { %v794_v12 = vpop.f32.mrf.mxu0  ;;  %1251 = vmatmul.mubr.bf16.gmra.mxu0 %v974_v5 }
 0x176   :  { %v907_v13 = vpop.f32.mrf.mxu1  ;;  %v904_v14 = vadd.f32 %v903_v7, %v791_v10  ;;  %v954_v15 = vmax.f32 %v902_v9, 0.0  ;;  %v795_v22 = vadd.f32 %v794_v12, %v3425_v32 }
 0x177   :  { %v796_v16 = vpop.f32.mrf.mxu0 }
 0x178   :  { %v909_v17 = vpop.f32.mrf.mxu1  ;;  %v955_v19 = vmax.f32 %v904_v14, 0.0  ;;  %v797_v20 = vadd.f32 %v796_v16, %v3422_v31  ;;  %v976_v27 = vpack.c.bf16 %v954_v15, %v952_v21  ;;  %v908_v37 = vadd.f32 %v907_v13, %v795_v22 }
 0x179   :  { %v798_v23 = vpop.f32.mrf.mxu0 }
 0x17a   :  { %v911_v24 = vpop.f32.mrf.mxu1  ;;  %v977_v25 = vpack.c.bf16 %v955_v19, %v953_v18  ;;  %v799_v26 = vadd.f32 %v798_v23, %v3425_v32  ;;  %v910_v34 = vadd.f32 %v909_v17, %v797_v20  ;;  %v956_v47 = vmax.f32 %v908_v37, 0.0  ;;  %v3041_v37 = vld [vmem:[#allocation10 + $0x54] ss:$8 sps:$4 sm:$0xff]  }
 0x17b   :  { %v800_v30 = vpop.f32.mrf.mxu0 }
 0x17c   :  { %v913_v33 = vpop.f32.mrf.mxu1  ;;  %v912_v35 = vadd.f32 %v911_v24, %v799_v26  ;;  %v801_v36 = vadd.f32 %v800_v30, %v3422_v31  ;;  %1260 = vmatprep.mubr.bf16.mxu0 %v977_v25  ;;  %v957_v44 = vmax.f32 %v910_v34, 0.0  ;;  %v3024_v25 = vld [vmem:[#allocation8 + $0xa0] ss:$8 sps:$4 sm:$0xff]   ;;  %v3029_v26 = vld [vmem:[#allocation8 + $0x94] ss:$8 sps:$4 sm:$0xff]  }
 0x17d   :  { %v804_v38 = vpop.f32.mrf.mxu0  ;;  %1261 = vmatmul.mubr.bf16.gmra.mxu0 %v976_v27  ;;  %v3027_v27 = vld [vmem:[#allocation8 + $0x90] ss:$8 sps:$4 sm:$0xff]   ;;  %v3030_v30 = vld [vmem:[#allocation8 + $0x80] ss:$8 sps:$4 sm:$0xff]   ;;  %v3035_v34 = vld [vmem:[#allocation10 + $0x74] ss:$8 sps:$4 sm:$0xff]  }
 0x17e   :  { %v917_v39 = vpop.f32.mrf.mxu1  ;;  %v914_v40 = vadd.f32 %v913_v33, %v801_v36  ;;  %v958_v41 = vmax.f32 %v912_v35, 0.0  ;;  %v805_v48 = vadd.f32 %v804_v38, %v3425_v32  ;;  %v3033_v33 = vld [vmem:[#allocation10 + $0x70] ss:$8 sps:$4 sm:$0xff]   ;;  %v3038_v35 = vld [vmem:[#allocation10 + $0x64] ss:$8 sps:$4 sm:$0xff]   ;;  %1918 = vmatprep.subr.bf16.mxu0 %v3035_v34 }
 0x17f   :  { %v806_v42 = vpop.f32.mrf.mxu0  ;;  %1919 = vmatpush1.bf16.msra.mxu0 %v3033_v33  ;;  %v3036_v36 = vld [vmem:[#allocation10 + $0x60] ss:$8 sps:$4 sm:$0xff]   ;;  %v3039_v38 = vld [vmem:[#allocation10 + $0x50] ss:$8 sps:$4 sm:$0xff]  }
 0x180   :  { %v919_v43 = vpop.f32.mrf.mxu1  ;;  %v959_v45 = vmax.f32 %v914_v40, 0.0  ;;  %v807_v46 = vadd.f32 %v806_v42, %v3422_v31  ;;  %v978_v53 = vpack.c.bf16 %v958_v41, %v956_v47  ;;  %v918_v59 = vadd.f32 %v917_v39, %v805_v48  ;;  %1920 = vmatprep.subr.bf16.mxu0 %v3038_v35  ;;  %v3044_v39 = vld [vmem:[#allocation10 + $0x44] ss:$8 sps:$4 sm:$0xff]   ;;  %v3042_v40 = vld [vmem:[#allocation10 + $0x40] ss:$8 sps:$4 sm:$0xff]  }
 0x181   :  { %v808_v49 = vpop.f32.mrf.mxu0  ;;  %v3047_v41 = vld [vmem:[#allocation10 + $0x34] ss:$8 sps:$4 sm:$0xff]   ;;  %v3045_v42 = vld [vmem:[#allocation10 + $0x30] ss:$8 sps:$4 sm:$0xff]   ;;  %v3056_v47 = vld [vmem:[#allocation10 + $0x4] ss:$8 sps:$4 sm:$0xff]  }
 0x182   :  { %v921_v50 = vpop.f32.mrf.mxu1  ;;  %v979_v51 = vpack.c.bf16 %v959_v45, %v957_v44  ;;  %v809_v52 = vadd.f32 %v808_v49, %v3425_v32  ;;  %v920_v56 = vadd.f32 %v919_v43, %v807_v46  ;;  %v960_v5 = vmax.f32 %v918_v59, 0.0  ;;  %v3050_v43 = vld [vmem:[#allocation10 + $0x24] ss:$8 sps:$4 sm:$0xff]   ;;  %v3048_v44 = vld [vmem:[#allocation10 + $0x20] ss:$8 sps:$4 sm:$0xff]  }
 0x183   :  { %v810_v54 = vpop.f32.mrf.mxu0  ;;  %1921 = vmatpush1.bf16.msra.mxu0 %v3036_v36  ;;  %v3053_v45 = vld [vmem:[#allocation10 + $0x14] ss:$8 sps:$4 sm:$0xff]   ;;  %v3051_v46 = vld [vmem:[#allocation10 + $0x10] ss:$8 sps:$4 sm:$0xff]   ;;  %v3054_v48 = vld [vmem:[#allocation10] ss:$8 sps:$4 sm:$0xff]  }
 0x184   :  { %v923_v55 = vpop.f32.mrf.mxu1  ;;  %v922_v57 = vadd.f32 %v921_v50, %v809_v52  ;;  %v811_v58 = vadd.f32 %v810_v54, %v3422_v31  ;;  %1270 = vmatprep.mubr.bf16.mxu0 %v979_v51  ;;  %v961_v2 = vmax.f32 %v920_v56, 0.0  ;;  %1922 = vmatprep.subr.bf16.mxu0 %v3041_v37  ;;  %v3059_v49 = vld [vmem:[#allocation10 + $0xf4] ss:$8 sps:$4 sm:$0xff]   ;;  %v3057_v50 = vld [vmem:[#allocation10 + $0xf0] ss:$8 sps:$4 sm:$0xff]  }
 0x185   :  { %v814_v60 = vpop.f32.mrf.mxu0  ;;  %1271 = vmatmul.mubr.bf16.gmra.mxu0 %v978_v53  ;;  %v3062_v51 = vld [vmem:[#allocation10 + $0xe4] ss:$8 sps:$4 sm:$0xff]   ;;  %v3060_v52 = vld [vmem:[#allocation10 + $0xe0] ss:$8 sps:$4 sm:$0xff]   ;;  %v3065_v53 = vld [vmem:[#allocation10 + $0xd4] ss:$8 sps:$4 sm:$0xff]  }
 0x186   :  { %v927_v61 = vpop.f32.mrf.mxu1  ;;  %v924_v62 = vadd.f32 %v923_v55, %v811_v58  ;;  %v962_v63 = vmax.f32 %v922_v57, 0.0  ;;  %v815_v6 = vadd.f32 %v814_v60, %v3425_v32  ;;  %v3063_v54 = vld [vmem:[#allocation10 + $0xd0] ss:$8 sps:$4 sm:$0xff]   ;;  %v3068_v55 = vld [vmem:[#allocation10 + $0xc4] ss:$8 sps:$4 sm:$0xff]  }
 0x187   :  { %v816_v0 = vpop.f32.mrf.mxu0  ;;  %1923 = vmatpush1.bf16.msra.mxu0 %v3039_v38  ;;  %v3066_v56 = vld [vmem:[#allocation10 + $0xc0] ss:$8 sps:$4 sm:$0xff]   ;;  %v3071_v57 = vld [vmem:[#allocation10 + $0xb4] ss:$8 sps:$4 sm:$0xff]   ;;  %v3069_v58 = vld [vmem:[#allocation10 + $0xb0] ss:$8 sps:$4 sm:$0xff]  }
 0x188   :  { %v929_v1 = vpop.f32.mrf.mxu1  ;;  %v963_v3 = vmax.f32 %v924_v62, 0.0  ;;  %v817_v4 = vadd.f32 %v816_v0, %v3422_v31  ;;  %v980_v11 = vpack.c.bf16 %v962_v63, %v960_v5  ;;  %v928_v16 = vadd.f32 %v927_v61, %v815_v6  ;;  %1924 = vmatprep.subr.bf16.mxu0 %v3044_v39  ;;  %v1016_v59 = vld [vmem:[%s3677_s4] sm:$0x3] }
 0x189   :  { %v818_v7 = vpop.f32.mrf.mxu0  ;;  %v3463_v61 = vrot.slane %v1016_v59, %v3414_v28  ;;  %v3466_v62 = vrot.slane %v1016_v59, %v3416_v29 }
 0x18a   :  { %v931_v8 = vpop.f32.mrf.mxu1  ;;  %v981_v9 = vpack.c.bf16 %v963_v3, %v961_v2  ;;  %v819_v10 = vadd.f32 %v818_v7, %v3425_v32  ;;  %v930_v13 = vadd.f32 %v929_v1, %v817_v4  ;;  %v964_v22 = vmax.f32 %v928_v16, 0.0  ;;  %v3026_v32 = vld [vmem:[#allocation8 + $0xa4] ss:$8 sps:$4 sm:$0xff]  }
 0x18b   :  { %v820_v12 = vpop.f32.mrf.mxu0  ;;  %1579 = vmatprep.subr.bf16.mxu1 %v3026_v32  ;;  %1925 = vmatpush1.bf16.msra.mxu0 %v3042_v40 }
 0x18c   :  { %v932_v14 = vadd.f32 %v931_v8, %v819_v10  ;;  %v821_v15 = vadd.f32 %v820_v12, %v3422_v31  ;;  %1280 = vmatprep.mubr.bf16.mxu0 %v981_v9  ;;  %v933_v17 = vpop.f32.mrf.mxu1  ;;  %v965_v20 = vmax.f32 %v930_v13, 0.0  ;;  %1580 = vmatpush2.bf16.msra.mxu1 %v3024_v25  ;;  %v3032_v31 = vld [vmem:[#allocation8 + $0x84] ss:$8 sps:$4 sm:$0xff]  }
 0x18d   :  { %1281 = vmatmul.mubr.bf16.gmra.mxu0 %v980_v11  ;;  %1581 = vmatprep.subr.bf16.mxu1 %v3029_v26 }
 0x18e   :  { %v934_v18 = vadd.f32 %v933_v17, %v821_v15  ;;  %v966_v19 = vmax.f32 %v932_v14, 0.0  ;;  %1926 = vmatprep.subr.bf16.mxu0 %v3047_v41 }
 0x18f   :  { %1927 = vmatpush1.bf16.msra.mxu0 %v3045_v42 }
 0x190   :  { %v967_v21 = vmax.f32 %v934_v18, 0.0  ;;  %v982_v24 = vpack.c.bf16 %v966_v19, %v964_v22  ;;  %1582 = vmatpush2.bf16.msra.mxu1 %v3027_v27  ;;  %1928 = vmatprep.subr.bf16.mxu0 %v3050_v43 }
 0x191   :  { %1583 = vmatprep.subr.bf16.mxu1 %v3032_v31 }
 0x192   :  { %v983_v23 = vpack.c.bf16 %v967_v21, %v965_v20 }
 0x193   :  { %1929 = vmatpush1.bf16.msra.mxu0 %v3048_v44 }
 0x194   :  { %1290 = vmatprep.mubr.bf16.mxu0 %v983_v23  ;;  %1584 = vmatpush2.bf16.msra.mxu1 %v3030_v30 }
 0x195   :  { %1291 = vmatmul.mubr.bf16.gmra.mxu0 %v982_v24  ;;  %1930 = vmatprep.subr.bf16.mxu0 %v3053_v45 }
 0x197   :  { %1931 = vmatpush1.bf16.msra.mxu0 %v3051_v46 }
 0x198   :  { %1932 = vmatprep.subr.bf16.mxu0 %v3056_v47 }
 0x19b   :  { %1933 = vmatpush1.bf16.msra.mxu0 %v3054_v48 }
 0x19c   :  { %1934 = vmatprep.subr.bf16.mxu0 %v3059_v49 }
 0x19f   :  { %1935 = vmatpush2.bf16.msra.mxu0 %v3057_v50 }
 0x1a0   :  { %1936 = vmatprep.subr.bf16.mxu0 %v3062_v51 }
 0x1a3   :  { %1937 = vmatpush2.bf16.msra.mxu0 %v3060_v52 }
 0x1a4   :  { %1938 = vmatprep.subr.bf16.mxu0 %v3065_v53 }
 0x1a7   :  { %1939 = vmatpush2.bf16.msra.mxu0 %v3063_v54 }
 0x1a8   :  { %1940 = vmatprep.subr.bf16.mxu0 %v3068_v55 }
 0x1ab   :  { %1941 = vmatpush2.bf16.msra.mxu0 %v3066_v56 }
 0x1ac   :  { %1942 = vmatprep.subr.bf16.mxu0 %v3071_v57 }
 0x1af   :  { %1943 = vmatpush2.bf16.msra.mxu0 %v3069_v58 }
 0x21d   :  { %v1222_v60 = vpop.f32.mrf.mxu0 }
 0x21e   :  { %v1223_v3 = vadd.f32 %v1222_v60, %v3466_v62 }
 0x21f   :  { %v1224_v63 = vpop.f32.mrf.mxu0 }
 0x220   :  { %v1225_v1 = vadd.f32 %v1224_v63, %v3463_v61  ;;  %v1301_v10 = vmax.f32 %v1223_v3, 0.0 }
 0x221   :  { %v1226_v0 = vpop.f32.mrf.mxu0 }
 0x222   :  { %v1227_v2 = vadd.f32 %v1226_v0, %v3466_v62  ;;  %v1302_v8 = vmax.f32 %v1225_v1, 0.0 }
 0x223   :  { %v1228_v4 = vpop.f32.mrf.mxu0 }
 0x224   :  { %v1229_v5 = vadd.f32 %v1228_v4, %v3463_v61  ;;  %v1303_v6 = vmax.f32 %v1227_v2, 0.0 }
 0x225   :  { %v1232_v7 = vpop.f32.mrf.mxu0 }
 0x226   :  { %v1304_v9 = vmax.f32 %v1229_v5, 0.0  ;;  %v1333_v13 = vpack.c.bf16 %v1303_v6, %v1301_v10  ;;  %v1233_v17 = vadd.f32 %v1232_v7, %v3466_v62 }
 0x227   :  { %v1234_v11 = vpop.f32.mrf.mxu0 }
 0x228   :  { %v1334_v12 = vpack.c.bf16 %v1304_v9, %v1302_v8  ;;  %v1235_v15 = vadd.f32 %v1234_v11, %v3463_v61  ;;  %v1305_v24 = vmax.f32 %v1233_v17, 0.0 }
 0x229   :  { %v1236_v14 = vpop.f32.mrf.mxu0 }
 0x22a   :  { %v1237_v16 = vadd.f32 %v1236_v14, %v3466_v62  ;;  %1585 = vmatprep.mubr.bf16.mxu1 %v1334_v12  ;;  %v1306_v22 = vmax.f32 %v1235_v15, 0.0 }
 0x22b   :  { %v1238_v18 = vpop.f32.mrf.mxu0  ;;  %1586 = vmatmul.mubr.bf16.vlgmr.msra.gmra.mxu1 %v1333_v13 }
 0x22c   :  { %v1239_v19 = vadd.f32 %v1238_v18, %v3463_v61  ;;  %v1307_v20 = vmax.f32 %v1237_v16, 0.0 }
 0x22d   :  { %v1242_v21 = vpop.f32.mrf.mxu0 }
 0x22e   :  { %v1308_v23 = vmax.f32 %v1239_v19, 0.0  ;;  %v1335_v26 = vpack.c.bf16 %v1307_v20, %v1305_v24  ;;  %v1243_v33 = vadd.f32 %v1242_v21, %v3466_v62 }
 0x22f   :  { %v1244_v32 = vpop.f32.mrf.mxu0 }
 0x230   :  { %v1336_v25 = vpack.c.bf16 %v1308_v23, %v1306_v22  ;;  %v1245_v31 = vadd.f32 %v1244_v32, %v3463_v61  ;;  %v1309_v40 = vmax.f32 %v1243_v33, 0.0 }
 0x231   :  { %v1246_v27 = vpop.f32.mrf.mxu0 }
 0x232   :  { %v1247_v30 = vadd.f32 %v1246_v27, %v3466_v62  ;;  %1595 = vmatprep.mubr.bf16.mxu1 %v1336_v25  ;;  %v1310_v38 = vmax.f32 %v1245_v31, 0.0 }
 0x233   :  { %v1248_v34 = vpop.f32.mrf.mxu0  ;;  %1596 = vmatmul.mubr.bf16.gmra.mxu1 %v1335_v26 }
 0x234   :  { %v1249_v35 = vadd.f32 %v1248_v34, %v3463_v61  ;;  %v1311_v36 = vmax.f32 %v1247_v30, 0.0 }
 0x235   :  { %v1252_v37 = vpop.f32.mrf.mxu0 }
 0x236   :  { %v1312_v39 = vmax.f32 %v1249_v35, 0.0  ;;  %v1337_v43 = vpack.c.bf16 %v1311_v36, %v1309_v40  ;;  %v1253_v47 = vadd.f32 %v1252_v37, %v3466_v62 }
 0x237   :  { %v1254_v41 = vpop.f32.mrf.mxu0 }
 0x238   :  { %v1338_v42 = vpack.c.bf16 %v1312_v39, %v1310_v38  ;;  %v1255_v45 = vadd.f32 %v1254_v41, %v3463_v61  ;;  %v1313_v54 = vmax.f32 %v1253_v47, 0.0 }
 0x239   :  { %v1256_v44 = vpop.f32.mrf.mxu0 }
 0x23a   :  { %v1257_v46 = vadd.f32 %v1256_v44, %v3466_v62  ;;  %1605 = vmatprep.mubr.bf16.mxu1 %v1338_v42  ;;  %v1314_v52 = vmax.f32 %v1255_v45, 0.0 }
 0x23b   :  { %v1258_v48 = vpop.f32.mrf.mxu0  ;;  %1606 = vmatmul.mubr.bf16.gmra.mxu1 %v1337_v43 }
 0x23c   :  { %v1259_v49 = vadd.f32 %v1258_v48, %v3463_v61  ;;  %v1315_v50 = vmax.f32 %v1257_v46, 0.0 }
 0x23d   :  { %v1262_v51 = vpop.f32.mrf.mxu0 }
 0x23e   :  { %v1316_v53 = vmax.f32 %v1259_v49, 0.0  ;;  %v1339_v57 = vpack.c.bf16 %v1315_v50, %v1313_v54  ;;  %v1263_v63 = vadd.f32 %v1262_v51, %v3466_v62  ;;  %v3077_v54 = vld [vmem:[#allocation10 + $0x94] ss:$8 sps:$4 sm:$0xff]  }
 0x23f   :  { %v1264_v55 = vpop.f32.mrf.mxu0 }
 0x240   :  { %v1340_v56 = vpack.c.bf16 %v1316_v53, %v1314_v52  ;;  %v1265_v59 = vadd.f32 %v1264_v55, %v3463_v61  ;;  %v1317_v6 = vmax.f32 %v1263_v63, 0.0  ;;  %v3074_v52 = vld [vmem:[#allocation10 + $0xa4] ss:$8 sps:$4 sm:$0xff]   ;;  %v3072_v53 = vld [vmem:[#allocation10 + $0xa0] ss:$8 sps:$4 sm:$0xff]  }
 0x241   :  { %v1266_v58 = vpop.f32.mrf.mxu0  ;;  %1944 = vmatprep.subr.bf16.mxu0 %v3074_v52  ;;  %v3075_v55 = vld [vmem:[#allocation10 + $0x90] ss:$8 sps:$4 sm:$0xff]   ;;  %v3086_v63 = vld [vmem:[#allocation11 + $0x28] sm:$0xff]  }
 0x242   :  { %v1267_v60 = vadd.f32 %v1266_v58, %v3466_v62  ;;  %1615 = vmatprep.mubr.bf16.mxu1 %v1340_v56  ;;  %v1318_v4 = vmax.f32 %v1265_v59, 0.0  ;;  %1945 = vmatpush2.bf16.msra.mxu0 %v3072_v53  ;;  %v3078_v56 = vld [vmem:[#allocation10 + $0x80] ss:$8 sps:$4 sm:$0xff]   ;;  %v3083_v58 = vld [vmem:[#allocation11 + $0x70] sm:$0xff]  }
 0x243   :  { %v1268_v0 = vpop.f32.mrf.mxu0  ;;  %1616 = vmatmul.mubr.bf16.gmra.mxu1 %v1339_v57  ;;  %1946 = vmatprep.subr.bf16.mxu0 %v3077_v54  ;;  %v3082_v57 = vld [vmem:[#allocation11 + $0x38] sm:$0xff]   ;;  %v3084_v59 = vld [vmem:[#allocation11 + $0x30] sm:$0xff]  }
 0x244   :  { %v1269_v1 = vadd.f32 %v1268_v0, %v3463_v61  ;;  %v1319_v2 = vmax.f32 %v1267_v60, 0.0  ;;  %v3085_v60 = vld [vmem:[#allocation11 + $0x68] sm:$0xff]   ;;  %v3087_v0 = vld [vmem:[#allocation11 + $0x60] sm:$0xff]  }
 0x245   :  { %v1272_v3 = vpop.f32.mrf.mxu0 }
 0x246   :  { %v1320_v5 = vmax.f32 %v1269_v1, 0.0  ;;  %v1341_v9 = vpack.c.bf16 %v1319_v2, %v1317_v6  ;;  %v1273_v13 = vadd.f32 %v1272_v3, %v3466_v62  ;;  %1947 = vmatpush2.bf16.msra.mxu0 %v3075_v55  ;;  %v3088_v1 = vld [vmem:[#allocation11 + $0x20] sm:$0xff]   ;;  %v3089_v2 = vld [vmem:[#allocation11 + $0x58] sm:$0xff]   ;;  %v3093_v6 = vld [vmem:[#allocation11 + $0x48] sm:$0xff]  }
 0x247   :  { %v1274_v7 = vpop.f32.mrf.mxu0  ;;  %v3090_v3 = vld [vmem:[#allocation11 + $0x18] sm:$0xff]  }
 0x248   :  { %v1342_v8 = vpack.c.bf16 %v1320_v5, %v1318_v4  ;;  %v1275_v11 = vadd.f32 %v1274_v7, %v3463_v61  ;;  %v1321_v20 = vmax.f32 %v1273_v13, 0.0  ;;  %v3091_v4 = vld [vmem:[#allocation11 + $0x50] sm:$0xff]   ;;  %v3094_v7 = vld [vmem:[#allocation11 + $0x8] sm:$0xff]  }
 0x249   :  { %v1276_v10 = vpop.f32.mrf.mxu0  ;;  %v3092_v5 = vld [vmem:[#allocation11 + $0x10] sm:$0xff]  }
 0x24a   :  { %v1277_v12 = vadd.f32 %v1276_v10, %v3466_v62  ;;  %1625 = vmatprep.mubr.bf16.mxu1 %v1342_v8  ;;  %v1322_v18 = vmax.f32 %v1275_v11, 0.0  ;;  %v1381_v8 = vld [vmem:[%s3679_s6] sm:$0x3] }
 0x24b   :  { %v1278_v14 = vpop.f32.mrf.mxu0  ;;  %1626 = vmatmul.mubr.bf16.gmra.mxu1 %v1341_v9  ;;  %v3504_v10 = vrot.slane %v1381_v8, %v3414_v28  ;;  %v3507_v11 = vrot.slane %v1381_v8, %v3416_v29 }
 0x24c   :  { %v1279_v15 = vadd.f32 %v1278_v14, %v3463_v61  ;;  %v1323_v16 = vmax.f32 %v1277_v12, 0.0 }
 0x24d   :  { %v1282_v17 = vpop.f32.mrf.mxu0 }
 0x24e   :  { %v1324_v19 = vmax.f32 %v1279_v15, 0.0  ;;  %v1343_v23 = vpack.c.bf16 %v1323_v16, %v1321_v20  ;;  %v1283_v26 = vadd.f32 %v1282_v17, %v3466_v62 }
 0x24f   :  { %v1284_v21 = vpop.f32.mrf.mxu0 }
 0x250   :  { %v1344_v22 = vpack.c.bf16 %v1324_v19, %v1322_v18  ;;  %v1285_v32 = vadd.f32 %v1284_v21, %v3463_v61  ;;  %v1325_v36 = vmax.f32 %v1283_v26, 0.0 }
 0x251   :  { %v1286_v24 = vpop.f32.mrf.mxu0 }
 0x252   :  { %v1287_v25 = vadd.f32 %v1286_v24, %v3466_v62  ;;  %1635 = vmatprep.mubr.bf16.mxu1 %v1344_v22  ;;  %v1326_v34 = vmax.f32 %v1285_v32, 0.0 }
 0x253   :  { %v1288_v27 = vpop.f32.mrf.mxu0  ;;  %1636 = vmatmul.mubr.bf16.gmra.mxu1 %v1343_v23 }
 0x254   :  { %v1289_v31 = vadd.f32 %v1288_v27, %v3463_v61  ;;  %v1327_v30 = vmax.f32 %v1287_v25, 0.0 }
 0x255   :  { %v1292_v33 = vpop.f32.mrf.mxu0 }
 0x256   :  { %v1328_v35 = vmax.f32 %v1289_v31, 0.0  ;;  %v1345_v39 = vpack.c.bf16 %v1327_v30, %v1325_v36  ;;  %v1293_v43 = vadd.f32 %v1292_v33, %v3466_v62 }
 0x257   :  { %v1294_v37 = vpop.f32.mrf.mxu0 }
 0x258   :  { %v1346_v38 = vpack.c.bf16 %v1328_v35, %v1326_v34  ;;  %v1295_v41 = vadd.f32 %v1294_v37, %v3463_v61  ;;  %v1329_v49 = vmax.f32 %v1293_v43, 0.0 }
 0x259   :  { %v1296_v40 = vpop.f32.mrf.mxu0 }
 0x25a   :  { %v1297_v42 = vadd.f32 %v1296_v40, %v3466_v62  ;;  %1645 = vmatprep.mubr.bf16.mxu1 %v1346_v38  ;;  %v1330_v47 = vmax.f32 %v1295_v41, 0.0  ;;  %v3080_v62 = vld [vmem:[#allocation10 + $0x84] ss:$8 sps:$4 sm:$0xff]  }
 0x25b   :  { %v1298_v44 = vpop.f32.mrf.mxu0  ;;  %1646 = vmatmul.mubr.bf16.gmra.mxu1 %v1345_v39  ;;  %1948 = vmatprep.subr.bf16.mxu0 %v3080_v62 }
 0x25c   :  { %v1299_v45 = vadd.f32 %v1298_v44, %v3463_v61  ;;  %v1331_v46 = vmax.f32 %v1297_v42, 0.0  ;;  %1949 = vmatpush2.bf16.msra.mxu0 %v3078_v56  ;;  %v3081_v61 = vld [vmem:[#allocation11 + $0x78] sm:$0xff]  }
 0x25d   :  { %2716 = vmatprep.subr.bf16.mxu1 %v3081_v61 }
 0x25e   :  { %v1332_v48 = vmax.f32 %v1299_v45, 0.0  ;;  %v1347_v51 = vpack.c.bf16 %v1331_v46, %v1329_v49  ;;  %2717 = vmatpush3.bf16.msra.mxu1 %v3082_v57 }
 0x25f   :  { %2718 = vmatprep.subr.bf16.mxu1 %v3083_v58 }
 0x260   :  { %v1348_v50 = vpack.c.bf16 %v1332_v48, %v1330_v47 }
 0x262   :  { %1655 = vmatprep.mubr.bf16.mxu1 %v1348_v50  ;;  %2719 = vmatpush3.bf16.msra.mxu1 %v3084_v59 }
 0x263   :  { %1656 = vmatmul.mubr.bf16.gmra.mxu1 %v1347_v51  ;;  %2720 = vmatprep.subr.bf16.mxu1 %v3085_v60 }
 0x266   :  { %2721 = vmatpush3.bf16.msra.mxu1 %v3086_v63 }
 0x267   :  { %2722 = vmatprep.subr.bf16.mxu1 %v3087_v0 }
 0x26a   :  { %2723 = vmatpush3.bf16.msra.mxu1 %v3088_v1 }
 0x26b   :  { %2724 = vmatprep.subr.bf16.mxu1 %v3089_v2 }
 0x26e   :  { %2725 = vmatpush3.bf16.msra.mxu1 %v3090_v3 }
 0x26f   :  { %2726 = vmatprep.subr.bf16.mxu1 %v3091_v4 }
 0x272   :  { %2727 = vmatpush3.bf16.msra.mxu1 %v3092_v5 }
 0x273   :  { %2728 = vmatprep.subr.bf16.mxu1 %v3093_v6 }
 0x276   :  { %2729 = vmatpush3.bf16.msra.mxu1 %v3094_v7 }
 0x2eb   :  { %v1587_v9 = vpop.f32.mrf.mxu1 }
 0x2ec   :  { %v1588_v16 = vadd.f32 %v1587_v9, %v3507_v11 }
 0x2ed   :  { %v1589_v12 = vpop.f32.mrf.mxu1 }
 0x2ee   :  { %v1590_v14 = vadd.f32 %v1589_v12, %v3504_v10  ;;  %v1666_v23 = vmax.f32 %v1588_v16, 0.0 }
 0x2ef   :  { %v1591_v13 = vpop.f32.mrf.mxu1 }
 0x2f0   :  { %v1592_v15 = vadd.f32 %v1591_v13, %v3507_v11  ;;  %v1667_v21 = vmax.f32 %v1590_v14, 0.0 }
 0x2f1   :  { %v1593_v17 = vpop.f32.mrf.mxu1 }
 0x2f2   :  { %v1594_v18 = vadd.f32 %v1593_v17, %v3504_v10  ;;  %v1668_v19 = vmax.f32 %v1592_v15, 0.0 }
 0x2f3   :  { %v1597_v20 = vpop.f32.mrf.mxu1 }
 0x2f4   :  { %v1669_v22 = vmax.f32 %v1594_v18, 0.0  ;;  %v1698_v25 = vpack.c.bf16 %v1668_v19, %v1666_v23  ;;  %v1598_v30 = vadd.f32 %v1597_v20, %v3507_v11 }
 0x2f5   :  { %v1599_v24 = vpop.f32.mrf.mxu1 }
 0x2f6   :  { %v1699_v32 = vpack.c.bf16 %v1669_v22, %v1667_v21  ;;  %v1600_v27 = vadd.f32 %v1599_v24, %v3504_v10  ;;  %v1670_v39 = vmax.f32 %v1598_v30, 0.0 }
 0x2f7   :  { %v1601_v26 = vpop.f32.mrf.mxu1 }
 0x2f8   :  { %v1602_v31 = vadd.f32 %v1601_v26, %v3507_v11  ;;  %1950 = vmatprep.mubr.bf16.mxu0 %v1699_v32  ;;  %v1671_v37 = vmax.f32 %v1600_v27, 0.0 }
 0x2f9   :  { %v1603_v33 = vpop.f32.mrf.mxu1  ;;  %1951 = vmatmul.mubr.bf16.vlgmr.msra.gmra.mxu0 %v1698_v25 }
 0x2fa   :  { %v1604_v34 = vadd.f32 %v1603_v33, %v3504_v10  ;;  %v1672_v35 = vmax.f32 %v1602_v31, 0.0 }
 0x2fb   :  { %v1607_v36 = vpop.f32.mrf.mxu1 }
 0x2fc   :  { %v1673_v38 = vmax.f32 %v1604_v34, 0.0  ;;  %v1700_v42 = vpack.c.bf16 %v1672_v35, %v1670_v39  ;;  %v1608_v46 = vadd.f32 %v1607_v36, %v3507_v11 }
 0x2fd   :  { %v1609_v40 = vpop.f32.mrf.mxu1 }
 0x2fe   :  { %v1701_v41 = vpack.c.bf16 %v1673_v38, %v1671_v37  ;;  %v1610_v44 = vadd.f32 %v1609_v40, %v3504_v10  ;;  %v1674_v53 = vmax.f32 %v1608_v46, 0.0 }
 0x2ff   :  { %v1611_v43 = vpop.f32.mrf.mxu1 }
 0x300   :  { %v1612_v45 = vadd.f32 %v1611_v43, %v3507_v11  ;;  %1960 = vmatprep.mubr.bf16.mxu0 %v1701_v41  ;;  %v1675_v51 = vmax.f32 %v1610_v44, 0.0 }
 0x301   :  { %v1613_v47 = vpop.f32.mrf.mxu1  ;;  %1961 = vmatmul.mubr.bf16.gmra.mxu0 %v1700_v42 }
 0x302   :  { %v1614_v48 = vadd.f32 %v1613_v47, %v3504_v10  ;;  %v1676_v49 = vmax.f32 %v1612_v45, 0.0 }
 0x303   :  { %v1617_v50 = vpop.f32.mrf.mxu1 }
 0x304   :  { %v1677_v52 = vmax.f32 %v1614_v48, 0.0  ;;  %v1702_v62 = vpack.c.bf16 %v1676_v49, %v1674_v53  ;;  %v1618_v58 = vadd.f32 %v1617_v50, %v3507_v11 }
 0x305   :  { %v1619_v54 = vpop.f32.mrf.mxu1 }
 0x306   :  { %v1703_v55 = vpack.c.bf16 %v1677_v52, %v1675_v51  ;;  %v1620_v61 = vadd.f32 %v1619_v54, %v3504_v10  ;;  %v1678_v3 = vmax.f32 %v1618_v58, 0.0 }
 0x307   :  { %v1621_v56 = vpop.f32.mrf.mxu1 }
 0x308   :  { %v1622_v57 = vadd.f32 %v1621_v56, %v3507_v11  ;;  %1970 = vmatprep.mubr.bf16.mxu0 %v1703_v55  ;;  %v1679_v1 = vmax.f32 %v1620_v61, 0.0 }
 0x309   :  { %v1623_v59 = vpop.f32.mrf.mxu1  ;;  %1971 = vmatmul.mubr.bf16.gmra.mxu0 %v1702_v62 }
 0x30a   :  { %v1624_v60 = vadd.f32 %v1623_v59, %v3504_v10  ;;  %v1680_v63 = vmax.f32 %v1622_v57, 0.0 }
 0x30b   :  { %v1627_v0 = vpop.f32.mrf.mxu1 }
 0x30c   :  { %v1681_v2 = vmax.f32 %v1624_v60, 0.0  ;;  %v1704_v6 = vpack.c.bf16 %v1680_v63, %v1678_v3  ;;  %v1628_v12 = vadd.f32 %v1627_v0, %v3507_v11 }
 0x30d   :  { %v1629_v4 = vpop.f32.mrf.mxu1 }
 0x30e   :  { %v1705_v5 = vpack.c.bf16 %v1681_v2, %v1679_v1  ;;  %v1630_v8 = vadd.f32 %v1629_v4, %v3504_v10  ;;  %v1682_v19 = vmax.f32 %v1628_v12, 0.0  ;;  %v3095_v1 = vld [vmem:[#allocation11 + $0x40] sm:$0xff]  }
 0x30f   :  { %v1631_v7 = vpop.f32.mrf.mxu1  ;;  %v3096_v2 = vld [vmem:[#allocation11] sm:$0xff]   ;;  %2730 = vmatprep.subr.bf16.mxu1 %v3095_v1 }
 0x310   :  { %v1632_v9 = vadd.f32 %v1631_v7, %v3507_v11  ;;  %1980 = vmatprep.mubr.bf16.mxu0 %v1705_v5  ;;  %v1683_v17 = vmax.f32 %v1630_v8, 0.0  ;;  %2731 = vmatpush3.bf16.msra.mxu1 %v3096_v2 }
 0x311   :  { %v1633_v13 = vpop.f32.mrf.mxu1  ;;  %1981 = vmatmul.mubr.bf16.gmra.mxu0 %v1704_v6 }
 0x312   :  { %v1634_v14 = vadd.f32 %v1633_v13, %v3504_v10  ;;  %v1684_v15 = vmax.f32 %v1632_v9, 0.0 }
 0x313   :  { %v1637_v16 = vpop.f32.mrf.mxu1 }
 0x314   :  { %v1685_v18 = vmax.f32 %v1634_v14, 0.0  ;;  %v1706_v22 = vpack.c.bf16 %v1684_v15, %v1682_v19  ;;  %v1638_v25 = vadd.f32 %v1637_v16, %v3507_v11 }
 0x315   :  { %v1639_v20 = vpop.f32.mrf.mxu1 }
 0x316   :  { %v1707_v21 = vpack.c.bf16 %v1685_v18, %v1683_v17  ;;  %v1640_v24 = vadd.f32 %v1639_v20, %v3504_v10  ;;  %v1686_v35 = vmax.f32 %v1638_v25, 0.0 }
 0x317   :  { %v1641_v23 = vpop.f32.mrf.mxu1 }
 0x318   :  { %v1642_v32 = vadd.f32 %v1641_v23, %v3507_v11  ;;  %1990 = vmatprep.mubr.bf16.mxu0 %v1707_v21  ;;  %v1687_v33 = vmax.f32 %v1640_v24, 0.0 }
 0x319   :  { %v1643_v26 = vpop.f32.mrf.mxu1  ;;  %1991 = vmatmul.mubr.bf16.gmra.mxu0 %v1706_v22 }
 0x31a   :  { %v1644_v27 = vadd.f32 %v1643_v26, %v3504_v10  ;;  %v1688_v31 = vmax.f32 %v1642_v32, 0.0 }
 0x31b   :  { %v1647_v30 = vpop.f32.mrf.mxu1 }
 0x31c   :  { %v1689_v34 = vmax.f32 %v1644_v27, 0.0  ;;  %v1708_v38 = vpack.c.bf16 %v1688_v31, %v1686_v35  ;;  %v1648_v42 = vadd.f32 %v1647_v30, %v3507_v11 }
 0x31d   :  { %v1649_v36 = vpop.f32.mrf.mxu1 }
 0x31e   :  { %v1709_v37 = vpack.c.bf16 %v1689_v34, %v1687_v33  ;;  %v1650_v40 = vadd.f32 %v1649_v36, %v3504_v10  ;;  %v1690_v49 = vmax.f32 %v1648_v42, 0.0 }
 0x31f   :  { %v1651_v39 = vpop.f32.mrf.mxu1 }
 0x320   :  { %v1652_v41 = vadd.f32 %v1651_v39, %v3507_v11  ;;  %2000 = vmatprep.mubr.bf16.mxu0 %v1709_v37  ;;  %v1691_v47 = vmax.f32 %v1650_v40, 0.0 }
 0x321   :  { %v1653_v43 = vpop.f32.mrf.mxu1  ;;  %2001 = vmatmul.mubr.bf16.gmra.mxu0 %v1708_v38 }
 0x322   :  { %v1654_v44 = vadd.f32 %v1653_v43, %v3504_v10  ;;  %v1692_v45 = vmax.f32 %v1652_v41, 0.0 }
 0x323   :  { %v1657_v46 = vpop.f32.mrf.mxu1 }
 0x324   :  { %v1693_v48 = vmax.f32 %v1654_v44, 0.0  ;;  %v1710_v52 = vpack.c.bf16 %v1692_v45, %v1690_v49  ;;  %v1658_v62 = vadd.f32 %v1657_v46, %v3507_v11 }
 0x325   :  { %v1659_v50 = vpop.f32.mrf.mxu1 }
 0x326   :  { %v1711_v51 = vpack.c.bf16 %v1693_v48, %v1691_v47  ;;  %v1660_v54 = vadd.f32 %v1659_v50, %v3504_v10  ;;  %v1694_v60 = vmax.f32 %v1658_v62, 0.0 }
 0x327   :  { %v1661_v53 = vpop.f32.mrf.mxu1 }
 0x328   :  { %v1662_v55 = vadd.f32 %v1661_v53, %v3507_v11  ;;  %2010 = vmatprep.mubr.bf16.mxu0 %v1711_v51  ;;  %v1695_v58 = vmax.f32 %v1660_v54, 0.0  ;;  %v1746_v11 = vld [vmem:[%s3681_s8] sm:$0x3] }
 0x329   :  { %v1663_v56 = vpop.f32.mrf.mxu1  ;;  %2011 = vmatmul.mubr.bf16.gmra.mxu0 %v1710_v52  ;;  %v3545_v4 = vrot.slane %v1746_v11, %v3414_v28 }
 0x32a   :  { %v1664_v61 = vadd.f32 %v1663_v56, %v3504_v10  ;;  %v1696_v57 = vmax.f32 %v1662_v55, 0.0  ;;  %v3548_v10 = vrot.slane %v1746_v11, %v3416_v29 }
 0x32c   :  { %v1697_v59 = vmax.f32 %v1664_v61, 0.0  ;;  %v1712_v0 = vpack.c.bf16 %v1696_v57, %v1694_v60 }
 0x32e   :  { %v1713_v63 = vpack.c.bf16 %v1697_v59, %v1695_v58 }
 0x330   :  { %2020 = vmatprep.mubr.bf16.mxu0 %v1713_v63 }
 0x331   :  { %2021 = vmatmul.mubr.bf16.gmra.mxu0 %v1712_v0 }
 0x3b9   :  { %v1952_v3 = vpop.f32.mrf.mxu0 }
 0x3ba   :  { %v1953_v9 = vadd.f32 %v1952_v3, %v3548_v10 }
 0x3bb   :  { %v1954_v5 = vpop.f32.mrf.mxu0 }
 0x3bc   :  { %v1955_v7 = vadd.f32 %v1954_v5, %v3545_v4  ;;  %v2031_v28 = vmax.f32 %v1953_v9, 0.0 }
 0x3bd   :  { %v1956_v6 = vpop.f32.mrf.mxu0 }
 0x3be   :  { %v1957_v8 = vadd.f32 %v1956_v6, %v3548_v10  ;;  %v2032_v16 = vmax.f32 %v1955_v7, 0.0 }
 0x3bf   :  { %v1958_v12 = vpop.f32.mrf.mxu0 }
 0x3c0   :  { %v1959_v13 = vadd.f32 %v1958_v12, %v3545_v4  ;;  %v2033_v14 = vmax.f32 %v1957_v8, 0.0 }
 0x3c1   :  { %v1962_v15 = vpop.f32.mrf.mxu0 }
 0x3c2   :  { %v2034_v17 = vmax.f32 %v1959_v13, 0.0  ;;  %v2063_v29 = vpack.c.bf16 %v2033_v14, %v2031_v28  ;;  %v1963_v23 = vadd.f32 %v1962_v15, %v3548_v10 }
 0x3c3   :  { %v1964_v18 = vpop.f32.mrf.mxu0 }
 0x3c4   :  { %v2064_v19 = vpack.c.bf16 %v2034_v17, %v2032_v16  ;;  %v1965_v21 = vadd.f32 %v1964_v18, %v3545_v4  ;;  %v2035_v30 = vmax.f32 %v1963_v23, 0.0 }
 0x3c5   :  { %v1966_v20 = vpop.f32.mrf.mxu0 }
 0x3c6   :  { %v1967_v22 = vadd.f32 %v1966_v20, %v3548_v10  ;;  %2246 = vmatprep.mubr.bf16.mxu1 %v2064_v19  ;;  %v2036_v27 = vmax.f32 %v1965_v21, 0.0 }
 0x3c7   :  { %v1968_v24 = vpop.f32.mrf.mxu0  ;;  %2247 = vmatmul.mubr.bf16.vlgmr.msra.gmra.mxu1 %v2063_v29 }
 0x3c8   :  { %v1969_v32 = vadd.f32 %v1968_v24, %v3545_v4  ;;  %v2037_v25 = vmax.f32 %v1967_v22, 0.0 }
 0x3c9   :  { %v1972_v26 = vpop.f32.mrf.mxu0 }
 0x3ca   :  { %v2038_v31 = vmax.f32 %v1969_v32, 0.0  ;;  %v2065_v35 = vpack.c.bf16 %v2037_v25, %v2035_v30  ;;  %v1973_v39 = vadd.f32 %v1972_v26, %v3548_v10 }
 0x3cb   :  { %v1974_v33 = vpop.f32.mrf.mxu0 }
 0x3cc   :  { %v2066_v34 = vpack.c.bf16 %v2038_v31, %v2036_v27  ;;  %v1975_v37 = vadd.f32 %v1974_v33, %v3545_v4  ;;  %v2039_v46 = vmax.f32 %v1973_v39, 0.0 }
 0x3cd   :  { %v1976_v36 = vpop.f32.mrf.mxu0 }
 0x3ce   :  { %v1977_v38 = vadd.f32 %v1976_v36, %v3548_v10  ;;  %2254 = vmatprep.mubr.bf16.mxu1 %v2066_v34  ;;  %v2040_v44 = vmax.f32 %v1975_v37, 0.0 }
 0x3cf   :  { %v1978_v40 = vpop.f32.mrf.mxu0  ;;  %2255 = vmatmul.mubr.bf16.gmra.mxu1 %v2065_v35 }
 0x3d0   :  { %v1979_v41 = vadd.f32 %v1978_v40, %v3545_v4  ;;  %v2041_v42 = vmax.f32 %v1977_v38, 0.0 }
 0x3d1   :  { %v1982_v43 = vpop.f32.mrf.mxu0 }
 0x3d2   :  { %v2042_v45 = vmax.f32 %v1979_v41, 0.0  ;;  %v2067_v49 = vpack.c.bf16 %v2041_v42, %v2039_v46  ;;  %v1983_v53 = vadd.f32 %v1982_v43, %v3548_v10 }
 0x3d3   :  { %v1984_v47 = vpop.f32.mrf.mxu0 }
 0x3d4   :  { %v2068_v48 = vpack.c.bf16 %v2042_v45, %v2040_v44  ;;  %v1985_v51 = vadd.f32 %v1984_v47, %v3545_v4  ;;  %v2043_v58 = vmax.f32 %v1983_v53, 0.0 }
 0x3d5   :  { %v1986_v50 = vpop.f32.mrf.mxu0 }
 0x3d6   :  { %v1987_v52 = vadd.f32 %v1986_v50, %v3548_v10  ;;  %2262 = vmatprep.mubr.bf16.mxu1 %v2068_v48  ;;  %v2044_v61 = vmax.f32 %v1985_v51, 0.0 }
 0x3d7   :  { %v1988_v54 = vpop.f32.mrf.mxu0  ;;  %2263 = vmatmul.mubr.bf16.gmra.mxu1 %v2067_v49 }
 0x3d8   :  { %v1989_v55 = vadd.f32 %v1988_v54, %v3545_v4  ;;  %v2045_v62 = vmax.f32 %v1987_v52, 0.0 }
 0x3d9   :  { %v1992_v56 = vpop.f32.mrf.mxu0 }
 0x3da   :  { %v2046_v57 = vmax.f32 %v1989_v55, 0.0  ;;  %v2069_v63 = vpack.c.bf16 %v2045_v62, %v2043_v58  ;;  %v1993_v11 = vadd.f32 %v1992_v56, %v3548_v10  ;;  %v3585_v56 = vld [vmem:[%s3683_s10] ss:$0 sm:$0xff]  ;;  %s3323_s10 = smov [#allocation13]  }
 0x3db   :  { %v1994_v59 = vpop.f32.mrf.mxu0  ;;  %s2492_s16 = sshll.u32 %s3323_s10, 4  ;;  %s2493_s16 = int_to_ptr.vmem [resolvable:$true] %s2492_s16 }
 0x3dc   :  { %v2070_v60 = vpack.c.bf16 %v2046_v57, %v2044_v61  ;;  %v1995_v1 = vadd.f32 %v1994_v59, %v3545_v4  ;;  %v2047_v12 = vmax.f32 %v1993_v11, 0.0  ;;  %s3281_s17 = scalar_lea.vmem %s2493_s16, 2048  ;;  %p3286_p3 = scmp.lt.s32.totalorder %s2493_s16, %s2493_s16 }
 0x3dd   :  { %v1996_v0 = vpop.f32.mrf.mxu0  ;;  %p3282_p2 = scmp.ne.s32.totalorder %s2493_s16, %s3281_s17  ;;  %p3287_p4 = scmp.lt.s32.totalorder %s3281_s17, %s3281_s17 }
 0x3de   :  { %v1997_v2 = vadd.f32 %v1996_v0, %v3548_v10  ;;  %2270 = vmatprep.mubr.bf16.mxu1 %v2070_v60  ;;  %v2048_v8 = vmax.f32 %v1995_v1, 0.0 }
 0x3df   :  { %v1998_v3 = vpop.f32.mrf.mxu0  ;;  %2271 = vmatmul.mubr.bf16.gmra.mxu1 %v2069_v63  ;;  %p3288_p5 = por %p3287_p4, %p3286_p3 }
 0x3e0   :  { %v1999_v5 = vadd.f32 %v1998_v3, %v3545_v4  ;;  %v2049_v6 = vmax.f32 %v1997_v2, 0.0 }
 0x3e1   :  { %v2002_v7 = vpop.f32.mrf.mxu0  ;;  %p3289_p6 = pnand %p3288_p5, %p3282_p2 }
 0x3e2   :  { %v2050_v9 = vmax.f32 %v1999_v5, 0.0  ;;  %v2071_v15 = vpack.c.bf16 %v2049_v6, %v2047_v12  ;;  %v2003_v18 = vadd.f32 %v2002_v7, %v3548_v10 }
 0x3e3   :  { %v2004_v13 = vpop.f32.mrf.mxu0 }
 0x3e4   :  { %v2072_v14 = vpack.c.bf16 %v2050_v9, %v2048_v8  ;;  %v2005_v17 = vadd.f32 %v2004_v13, %v3545_v4  ;;  %v2051_v24 = vmax.f32 %v2003_v18, 0.0 }
 0x3e5   :  { %v2006_v16 = vpop.f32.mrf.mxu0 }
 0x3e6   :  { %v2007_v28 = vadd.f32 %v2006_v16, %v3548_v10  ;;  %2278 = vmatprep.mubr.bf16.mxu1 %v2072_v14  ;;  %v2052_v22 = vmax.f32 %v2005_v17, 0.0 }
 0x3e7   :  { %v2008_v19 = vpop.f32.mrf.mxu0  ;;  %2279 = vmatmul.mubr.bf16.gmra.mxu1 %v2071_v15 }
 0x3e8   :  { %v2009_v29 = vadd.f32 %v2008_v19, %v3545_v4  ;;  %v2053_v20 = vmax.f32 %v2007_v28, 0.0 }
 0x3e9   :  { %v2012_v21 = vpop.f32.mrf.mxu0 }
 0x3ea   :  { %v2054_v23 = vmax.f32 %v2009_v29, 0.0  ;;  %v2073_v26 = vpack.c.bf16 %v2053_v20, %v2051_v24  ;;  %v2013_v33 = vadd.f32 %v2012_v21, %v3548_v10 }
 0x3eb   :  { %v2014_v32 = vpop.f32.mrf.mxu0 }
 0x3ec   :  { %v2074_v25 = vpack.c.bf16 %v2054_v23, %v2052_v22  ;;  %v2015_v31 = vadd.f32 %v2014_v32, %v3545_v4  ;;  %v2055_v40 = vmax.f32 %v2013_v33, 0.0 }
 0x3ed   :  { %v2016_v27 = vpop.f32.mrf.mxu0 }
 0x3ee   :  { %v2017_v30 = vadd.f32 %v2016_v27, %v3548_v10  ;;  %2286 = vmatprep.mubr.bf16.mxu1 %v2074_v25  ;;  %v2056_v38 = vmax.f32 %v2015_v31, 0.0 }
 0x3ef   :  { %v2018_v34 = vpop.f32.mrf.mxu0  ;;  %2287 = vmatmul.mubr.bf16.gmra.mxu1 %v2073_v26 }
 0x3f0   :  { %v2019_v35 = vadd.f32 %v2018_v34, %v3545_v4  ;;  %v2057_v36 = vmax.f32 %v2017_v30, 0.0 }
 0x3f1   :  { %v2022_v37 = vpop.f32.mrf.mxu0 }
 0x3f2   :  { %v2058_v39 = vmax.f32 %v2019_v35, 0.0  ;;  %v2075_v43 = vpack.c.bf16 %v2057_v36, %v2055_v40  ;;  %v2023_v47 = vadd.f32 %v2022_v37, %v3548_v10 }
 0x3f3   :  { %v2024_v41 = vpop.f32.mrf.mxu0 }
 0x3f4   :  { %v2076_v42 = vpack.c.bf16 %v2058_v39, %v2056_v38  ;;  %v2025_v45 = vadd.f32 %v2024_v41, %v3545_v4  ;;  %v2059_v53 = vmax.f32 %v2023_v47, 0.0 }
 0x3f5   :  { %v2026_v44 = vpop.f32.mrf.mxu0 }
 0x3f6   :  { %v2027_v46 = vadd.f32 %v2026_v44, %v3548_v10  ;;  %2294 = vmatprep.mubr.bf16.mxu1 %v2076_v42  ;;  %v2060_v51 = vmax.f32 %v2025_v45, 0.0 }
 0x3f7   :  { %v2028_v48 = vpop.f32.mrf.mxu0  ;;  %2295 = vmatmul.mubr.bf16.gmra.mxu1 %v2075_v43 }
 0x3f8   :  { %v2029_v49 = vadd.f32 %v2028_v48, %v3545_v4  ;;  %v2061_v50 = vmax.f32 %v2027_v46, 0.0 }
 0x3fa   :  { %v2062_v52 = vmax.f32 %v2029_v49, 0.0  ;;  %v2077_v55 = vpack.c.bf16 %v2061_v50, %v2059_v53 }
 0x3fc   :  { %v2078_v54 = vpack.c.bf16 %v2062_v52, %v2060_v51 }
 0x3fe   :  { %2302 = vmatprep.mubr.bf16.mxu1 %v2078_v54 }
 0x3ff   :  { %2303 = vmatmul.mubr.bf16.gmra.mxu1 %v2077_v55 }
 0x487   :  { %v2732_v62 = vpop.f32.mrf.mxu1 }
 0x489   :  { %v2733_v61 = vpop.f32.mrf.mxu1 }
 0x48a   :  { %v2734_v10 = vadd.f32 %v2733_v61, %v2732_v62 }
 0x48b   :  { %v2735_v57 = vpop.f32.mrf.mxu1 }
 0x48c   :  { %v2249_v58 = vadd.f32 %v2734_v10, %v3585_v56 }
 0x48d   :  { %v2736_v4 = vpop.f32.mrf.mxu1 }
 0x48e   :  { %v3588_v59 = vadd.f32 -1.0, %v2249_v58  ;;  %v2737_v60 = vadd.f32 %v2736_v4, %v2735_v57 }
 0x48f   :  { %v2738_v63 = vpop.f32.mrf.mxu1 }
 0x490   :  { %v2343_v0 = vand.u32 2147483647, %v3588_v59  ;;  %v2252_v1 = vadd.f32 %v2737_v60, %v3585_v56 }
 0x491   :  { %v2739_v2 = vpop.f32.mrf.mxu1 }
 0x492   :  { %v2359_v11 = vsub.f32 0.0, %v2343_v0  ;;  %v3592_v3 = vadd.f32 -1.0, %v2252_v1  ;;  %v2740_v5 = vadd.f32 %v2739_v2, %v2738_v63 }
 0x493   :  { %v2741_v6 = vpop.f32.mrf.mxu1 }
 0x494   :  { %v2375_v7 = vmul.f32 1.442695, %v2359_v11  ;;  %v2344_v8 = vand.u32 2147483647, %v3592_v3  ;;  %v2257_v9 = vadd.f32 %v2740_v5, %v3585_v56 }
 0x495   :  { %v2742_v12 = vpop.f32.mrf.mxu1 }
 0x496   :  { %3097 = vpow2.f32 %v2375_v7  ;;  %v2360_v13 = vsub.f32 0.0, %v2344_v8  ;;  %v3596_v14 = vadd.f32 -1.0, %v2257_v9  ;;  %v2743_v15 = vadd.f32 %v2742_v12, %v2741_v6 }
 0x497   :  { %v2744_v16 = vpop.f32.mrf.mxu1 }
 0x498   :  { %v2377_v17 = vmul.f32 1.442695, %v2360_v13  ;;  %v2345_v28 = vand.u32 2147483647, %v3596_v14  ;;  %v2260_v18 = vadd.f32 %v2743_v15, %v3585_v56 }
 0x499   :  { %v2745_v19 = vpop.f32.mrf.mxu1 }
 0x49a   :  { %3099 = vpow2.f32 %v2377_v17  ;;  %v2361_v29 = vsub.f32 0.0, %v2345_v28  ;;  %v3600_v20 = vadd.f32 -1.0, %v2260_v18  ;;  %v2746_v21 = vadd.f32 %v2745_v19, %v2744_v16 }
 0x49b   :  { %v2747_v22 = vpop.f32.mrf.mxu1 }
 0x49c   :  { %v2379_v23 = vmul.f32 1.442695, %v2361_v29  ;;  %v2346_v24 = vand.u32 2147483647, %v3600_v20  ;;  %v2265_v32 = vadd.f32 %v2746_v21, %v3585_v56 }
 0x49d   :  { %v2748_v25 = vpop.f32.mrf.mxu1 }
 0x49e   :  { %3101 = vpow2.f32 %v2379_v23  ;;  %v2362_v26 = vsub.f32 0.0, %v2346_v24  ;;  %v3604_v27 = vadd.f32 -1.0, %v2265_v32  ;;  %v2749_v31 = vadd.f32 %v2748_v25, %v2747_v22 }
 0x49f   :  { %v2750_v30 = vpop.f32.mrf.mxu1  ;;  %v2327_v22 = vmax.f32 %v3588_v59, 0.0  ;;  %v2328_v59 = vmax.f32 %v3592_v3, 0.0  ;;  %v2329_v3 = vmax.f32 %v3596_v14, 0.0  ;;  %v2330_v14 = vmax.f32 %v3600_v20, 0.0 }
 0x4a0   :  { %v2381_v33 = vmul.f32 1.442695, %v2362_v26  ;;  %v2347_v34 = vand.u32 2147483647, %v3604_v27  ;;  %v2268_v35 = vadd.f32 %v2749_v31, %v3585_v56 }
 0x4a1   :  { %v2751_v36 = vpop.f32.mrf.mxu1 }
 0x4a2   :  { %3103 = vpow2.f32 %v2381_v33  ;;  %v2363_v37 = vsub.f32 0.0, %v2347_v34  ;;  %v3608_v38 = vadd.f32 -1.0, %v2268_v35  ;;  %v2752_v39 = vadd.f32 %v2751_v36, %v2750_v30 }
 0x4a3   :  { %v3098_v40 = vpop.eup %3097  ;;  %v2753_v41 = vpop.f32.mrf.mxu1 }
 0x4a4   :  { %v2407_v42 = vadd.f32 1.0, %v3098_v40  ;;  %v2383_v43 = vmul.f32 1.442695, %v2363_v37  ;;  %v2348_v44 = vand.u32 2147483647, %v3608_v38  ;;  %v2273_v45 = vadd.f32 %v2752_v39, %v3585_v56 }
 0x4a5   :  { %v2754_v46 = vpop.f32.mrf.mxu1 }
 0x4a6   :  { %3105 = vlog2.f32 %v2407_v42  ;;  %v2364_v47 = vsub.f32 0.0, %v2348_v44  ;;  %v2755_v48 = vadd.f32 %v2754_v46, %v2753_v41  ;;  %v3612_v50 = vadd.f32 -1.0, %v2273_v45 }
 0x4a7   :  { %v3100_v49 = vpop.eup %3099  ;;  %3107 = vpow2.f32 %v2383_v43  ;;  %v2756_v51 = vpop.f32.mrf.mxu1 }
 0x4a8   :  { %v2408_v52 = vadd.f32 1.0, %v3100_v49  ;;  %v2385_v53 = vmul.f32 1.442695, %v2364_v47  ;;  %v2276_v54 = vadd.f32 %v2755_v48, %v3585_v56  ;;  %v2349_v55 = vand.u32 2147483647, %v3612_v50 }
 0x4a9   :  { %v2757_v62 = vpop.f32.mrf.mxu1 }
 0x4aa   :  { %3109 = vlog2.f32 %v2408_v52  ;;  %v3616_v61 = vadd.f32 -1.0, %v2276_v54  ;;  %v2758_v10 = vadd.f32 %v2757_v62, %v2756_v51  ;;  %v2365_v58 = vsub.f32 0.0, %v2349_v55 }
 0x4ab   :  { %v3102_v57 = vpop.eup %3101  ;;  %3111 = vpow2.f32 %v2385_v53  ;;  %v2759_v4 = vpop.f32.mrf.mxu1 }
 0x4ac   :  { %v2409_v60 = vadd.f32 1.0, %v3102_v57  ;;  %v2350_v63 = vand.u32 2147483647, %v3616_v61  ;;  %v2281_v0 = vadd.f32 %v2758_v10, %v3585_v56  ;;  %v2387_v1 = vmul.f32 1.442695, %v2365_v58 }
 0x4ad   :  { %v2760_v2 = vpop.f32.mrf.mxu1 }
 0x4ae   :  { %3113 = vlog2.f32 %v2409_v60  ;;  %v2366_v11 = vsub.f32 0.0, %v2350_v63  ;;  %v3620_v5 = vadd.f32 -1.0, %v2281_v0  ;;  %v2761_v6 = vadd.f32 %v2760_v2, %v2759_v4 }
 0x4af   :  { %v3104_v7 = vpop.eup %3103  ;;  %3115 = vpow2.f32 %v2387_v1  ;;  %v2762_v8 = vpop.f32.mrf.mxu1 }
 0x4b0   :  { %v2410_v9 = vadd.f32 1.0, %v3104_v7  ;;  %v2389_v12 = vmul.f32 1.442695, %v2366_v11  ;;  %v2351_v13 = vand.u32 2147483647, %v3620_v5  ;;  %v2284_v15 = vadd.f32 %v2761_v6, %v3585_v56 }
 0x4b1   :  { %v2763_v16 = vpop.f32.mrf.mxu1 }
 0x4b2   :  { %3117 = vlog2.f32 %v2410_v9  ;;  %v2367_v17 = vsub.f32 0.0, %v2351_v13  ;;  %v2764_v28 = vadd.f32 %v2763_v16, %v2762_v8  ;;  %v3624_v19 = vadd.f32 -1.0, %v2284_v15 }
 0x4b3   :  { %v3106_v18 = vpop.eup %3105  ;;  %3119 = vpow2.f32 %v2389_v12  ;;  %v2765_v29 = vpop.f32.mrf.mxu1 }
 0x4b4   :  { %v3108_v21 = vpop.eup %3107  ;;  %v2424_v23 = vmul.f32 0.6931472, %v3106_v18  ;;  %v2391_v24 = vmul.f32 1.442695, %v2367_v17  ;;  %v2289_v32 = vadd.f32 %v2764_v28, %v3585_v56  ;;  %v2352_v26 = vand.u32 2147483647, %v3624_v19 }
 0x4b5   :  { %v2411_v25 = vadd.f32 1.0, %v3108_v21  ;;  %v2766_v31 = vpop.f32.mrf.mxu1 }
 0x4b6   :  { %v2455_v30 = vadd.f32 %v2424_v23, %v2327_v22  ;;  %3121 = vpow2.f32 %v2391_v24  ;;  %v3629_v33 = vadd.f32 -1.0, %v2289_v32  ;;  %v2767_v34 = vadd.f32 %v2766_v31, %v2765_v29 }
 0x4b7   :  { %v3110_v35 = vpop.eup %3109  ;;  %3123 = vlog2.f32 %v2411_v25  ;;  %v2368_v36 = vsub.f32 0.0, %v2352_v26  ;;  %v2768_v37 = vpop.f32.mrf.mxu1  ;;  %v2331_v23 = vmax.f32 %v3604_v27, 0.0  ;;  %v2332_v27 = vmax.f32 %v3608_v38, 0.0 }
 0x4b8   :  { %v3112_v39 = vpop.eup %3111  ;;  %2471 = vst [vmem:[#allocation13] sm:$0xff] %v2455_v30  ;;  %v2426_v40 = vmul.f32 0.6931472, %v3110_v35  ;;  %v2353_v41 = vand.u32 2147483647, %v3629_v33  ;;  %v2292_v42 = vadd.f32 %v2767_v34, %v3585_v56 }
 0x4b9   :  { %v2412_v43 = vadd.f32 1.0, %v3112_v39  ;;  %v2393_v44 = vmul.f32 1.442695, %v2368_v36  ;;  %v2769_v45 = vpop.f32.mrf.mxu1 }
 0x4ba   :  { %v2456_v46 = vadd.f32 %v2426_v40, %v2328_v59  ;;  %v2369_v47 = vsub.f32 0.0, %v2353_v41  ;;  %v3634_v48 = vadd.f32 -1.0, %v2292_v42  ;;  %v2770_v49 = vadd.f32 %v2769_v45, %v2768_v37 }
 0x4bb   :  { %v3114_v51 = vpop.eup %3113  ;;  %3125 = vlog2.f32 %v2412_v43  ;;  %v2771_v52 = vpop.f32.mrf.mxu1 }
 0x4bc   :  { %v3116_v53 = vpop.eup %3115  ;;  %2472 = vst [vmem:[#allocation13 + $0x8] sm:$0xff] %v2456_v46  ;;  %v2428_v54 = vmul.f32 0.6931472, %v3114_v51  ;;  %3127 = vpow2.f32 %v2393_v44  ;;  %v2395_v55 = vmul.f32 1.442695, %v2369_v47  ;;  %v2297_v57 = vadd.f32 %v2770_v49, %v3585_v56 }
 0x4bd   :  { %v2413_v62 = vadd.f32 1.0, %v3116_v53  ;;  %v2354_v10 = vand.u32 2147483647, %v3634_v48  ;;  %v2772_v58 = vpop.f32.mrf.mxu1 }
 0x4be   :  { %v2457_v4 = vadd.f32 %v2428_v54, %v2329_v3  ;;  %3129 = vpow2.f32 %v2395_v55  ;;  %v2773_v60 = vadd.f32 %v2772_v58, %v2771_v52  ;;  %v3639_v1 = vadd.f32 -1.0, %v2297_v57 }
 0x4bf   :  { %v3118_v63 = vpop.eup %3117  ;;  %3131 = vlog2.f32 %v2413_v62  ;;  %v2370_v0 = vsub.f32 0.0, %v2354_v10  ;;  %v2774_v2 = vpop.f32.mrf.mxu1  ;;  %v2334_v10 = vmax.f32 %v3616_v61, 0.0  ;;  %v2336_v61 = vmax.f32 %v3624_v19, 0.0 }
 0x4c0   :  { %v3120_v11 = vpop.eup %3119  ;;  %2473 = vst [vmem:[#allocation13 + $0x10] sm:$0xff] %v2457_v4  ;;  %v2430_v6 = vmul.f32 0.6931472, %v3118_v63  ;;  %v2300_v7 = vadd.f32 %v2773_v60, %v3585_v56  ;;  %v2355_v12 = vand.u32 2147483647, %v3639_v1 }
 0x4c1   :  { %v2414_v8 = vadd.f32 1.0, %v3120_v11  ;;  %v2397_v9 = vmul.f32 1.442695, %v2370_v0  ;;  %v2775_v13 = vpop.f32.mrf.mxu1 }
 0x4c2   :  { %v2458_v15 = vadd.f32 %v2430_v6, %v2330_v14  ;;  %v3644_v16 = vadd.f32 -1.0, %v2300_v7  ;;  %v2776_v17 = vadd.f32 %v2775_v13, %v2774_v2  ;;  %v2371_v18 = vsub.f32 0.0, %v2355_v12 }
 0x4c3   :  { %v3122_v28 = vpop.eup %3121  ;;  %3133 = vlog2.f32 %v2414_v8  ;;  %v2777_v29 = vpop.f32.mrf.mxu1 }
 0x4c4   :  { %v3124_v21 = vpop.eup %3123  ;;  %2474 = vst [vmem:[#allocation13 + $0x18] sm:$0xff] %v2458_v15  ;;  %v2415_v22 = vadd.f32 1.0, %v3122_v28  ;;  %3135 = vpow2.f32 %v2397_v9  ;;  %v2356_v20 = vand.u32 2147483647, %v3644_v16  ;;  %v2399_v32 = vmul.f32 1.442695, %v2371_v18 }
 0x4c5   :  { %v2432_v24 = vmul.f32 0.6931472, %v3124_v21  ;;  %v2305_v25 = vadd.f32 %v2776_v17, %v3585_v56  ;;  %v2778_v26 = vpop.f32.mrf.mxu1  ;;  %v2337_v15 = vmax.f32 %v3629_v33, 0.0 }
 0x4c6   :  { %3137 = vlog2.f32 %v2415_v22  ;;  %v2372_v31 = vsub.f32 0.0, %v2356_v20  ;;  %v2779_v30 = vadd.f32 %v2778_v26, %v2777_v29  ;;  %v2338_v22 = vmax.f32 %v3634_v48, 0.0 }
 0x4c7   :  { %v2459_v34 = vadd.f32 %v2432_v24, %v2331_v23  ;;  %3139 = vpow2.f32 %v2399_v32  ;;  %v3649_v35 = vadd.f32 -1.0, %v2305_v25  ;;  %v2339_v24 = vmax.f32 %v3639_v1, 0.0 }
 0x4c8   :  { %v3126_v36 = vpop.eup %3125  ;;  %v2401_v37 = vmul.f32 1.442695, %v2372_v31  ;;  %v2308_v39 = vadd.f32 %v2779_v30, %v3585_v56  ;;  %v2333_v56 = vmax.f32 %v3612_v50, 0.0  ;;  %v2335_v50 = vmax.f32 %v3620_v5, 0.0 }
 0x4c9   :  { %v3128_v59 = vpop.eup %3127  ;;  %2475 = vst [vmem:[#allocation13 + $0x20] sm:$0xff] %v2459_v34  ;;  %v2434_v40 = vmul.f32 0.6931472, %v3126_v36  ;;  %v2357_v41 = vand.u32 2147483647, %v3649_v35  ;;  %v2340_v26 = vmax.f32 %v3644_v16, 0.0 }
 0x4ca   :  { %v2416_v42 = vadd.f32 1.0, %v3128_v59  ;;  %3141 = vpow2.f32 %v2401_v37  ;;  %v3654_v43 = vadd.f32 -1.0, %v2308_v39  ;;  %v2341_v36 = vmax.f32 %v3649_v35, 0.0 }
 0x4cb   :  { %v3130_v44 = vpop.eup %3129  ;;  %v2460_v45 = vadd.f32 %v2434_v40, %v2332_v27  ;;  %v2373_v46 = vsub.f32 0.0, %v2357_v41 }
 0x4cc   :  { %v3132_v47 = vpop.eup %3131  ;;  %3143 = vlog2.f32 %v2416_v42  ;;  %v2417_v49 = vadd.f32 1.0, %v3130_v44  ;;  %v2358_v51 = vand.u32 2147483647, %v3654_v43  ;;  %v2342_v1 = vmax.f32 %v3654_v43, 0.0 }
 0x4cd   :  { %2476 = vst [vmem:[#allocation13 + $0x28] sm:$0xff] %v2460_v45  ;;  %v2436_v52 = vmul.f32 0.6931472, %v3132_v47  ;;  %v2403_v38 = vmul.f32 1.442695, %v2373_v46 }
 0x4ce   :  { %3145 = vlog2.f32 %v2417_v49  ;;  %v2374_v53 = vsub.f32 0.0, %v2358_v51 }
 0x4cf   :  { %v2461_v3 = vadd.f32 %v2436_v52, %v2333_v56  ;;  %3147 = vpow2.f32 %v2403_v38 }
 0x4d0   :  { %v3134_v54 = vpop.eup %3133  ;;  %v2405_v55 = vmul.f32 1.442695, %v2374_v53 }
 0x4d1   :  { %v3136_v62 = vpop.eup %3135  ;;  %2477 = vst [vmem:[#allocation13 + $0x30] sm:$0xff] %v2461_v3  ;;  %v2438_v57 = vmul.f32 0.6931472, %v3134_v54 }
 0x4d2   :  { %v2418_v58 = vadd.f32 1.0, %v3136_v62  ;;  %3149 = vpow2.f32 %v2405_v55 }
 0x4d3   :  { %v3138_v4 = vpop.eup %3137  ;;  %v2462_v60 = vadd.f32 %v2438_v57, %v2334_v10 }
 0x4d4   :  { %v3140_v63 = vpop.eup %3139  ;;  %v2440_v0 = vmul.f32 0.6931472, %v3138_v4  ;;  %3151 = vlog2.f32 %v2418_v58 }
 0x4d5   :  { %2478 = vst [vmem:[#allocation13 + $0x38] sm:$0xff] %v2462_v60  ;;  %v2419_v2 = vadd.f32 1.0, %v3140_v63 }
 0x4d6   :  { %v2463_v11 = vadd.f32 %v2440_v0, %v2335_v50 }
 0x4d7   :  { %v3142_v14 = vpop.eup %3141  ;;  %3153 = vlog2.f32 %v2419_v2 }
 0x4d8   :  { %2479 = vst [vmem:[#allocation13 + $0x40] sm:$0xff] %v2463_v11  ;;  %v2420_v6 = vadd.f32 1.0, %v3142_v14 }
 0x4d9   :  { %v3144_v7 = vpop.eup %3143 }
 0x4da   :  { %v2442_v8 = vmul.f32 0.6931472, %v3144_v7  ;;  %3155 = vlog2.f32 %v2420_v6 }
 0x4db   :  { %v3146_v9 = vpop.eup %3145 }
 0x4dc   :  { %v3148_v12 = vpop.eup %3147  ;;  %v2464_v13 = vadd.f32 %v2442_v8, %v2336_v61  ;;  %v2444_v5 = vmul.f32 0.6931472, %v3146_v9 }
 0x4dd   :  { %v2421_v17 = vadd.f32 1.0, %v3148_v12 }
 0x4de   :  { %2480 = vst [vmem:[#allocation13 + $0x48] sm:$0xff] %v2464_v13  ;;  %v2465_v28 = vadd.f32 %v2444_v5, %v2337_v15 }
 0x4df   :  { %v3150_v18 = vpop.eup %3149  ;;  %3157 = vlog2.f32 %v2421_v17 }
 0x4e0   :  { %2481 = vst [vmem:[#allocation13 + $0x50] sm:$0xff] %v2465_v28  ;;  %v2422_v29 = vadd.f32 1.0, %v3150_v18 }
 0x4e1   :  { %v3152_v21 = vpop.eup %3151 }
 0x4e2   :  { %v2446_v20 = vmul.f32 0.6931472, %v3152_v21  ;;  %3159 = vlog2.f32 %v2422_v29 }
 0x4e4   :  { %v3154_v19 = vpop.eup %3153  ;;  %v2466_v23 = vadd.f32 %v2446_v20, %v2338_v22 }
 0x4e5   :  { %v2448_v32 = vmul.f32 0.6931472, %v3154_v19 }
 0x4e6   :  { %2482 = vst [vmem:[#allocation13 + $0x58] sm:$0xff] %v2466_v23 }
 0x4e7   :  { %v3156_v33 = vpop.eup %3155  ;;  %v2467_v25 = vadd.f32 %v2448_v32, %v2339_v24 }
 0x4e8   :  { %v2450_v31 = vmul.f32 0.6931472, %v3156_v33 }
 0x4e9   :  { %2483 = vst [vmem:[#allocation13 + $0x60] sm:$0xff] %v2467_v25 }
 0x4ea   :  { %v2468_v30 = vadd.f32 %v2450_v31, %v2340_v26 }
 0x4ec   :  { %v3158_v34 = vpop.eup %3157  ;;  %2484 = vst [vmem:[#allocation13 + $0x68] sm:$0xff] %v2468_v30 }
 0x4ed   :  { %v2452_v48 = vmul.f32 0.6931472, %v3158_v34 }
 0x4ef   :  { %v3160_v37 = vpop.eup %3159  ;;  %v2469_v39 = vadd.f32 %v2452_v48, %v2341_v36 }
 0x4f0   :  { %v2454_v59 = vmul.f32 0.6931472, %v3160_v37 }
 0x4f1   :  { %2485 = vst [vmem:[#allocation13 + $0x70] sm:$0xff] %v2469_v39 }
 0x4f2   :  { %v2470_v27 = vadd.f32 %v2454_v59, %v2342_v1 }
 0x4f4   :  { %2486 = vst [vmem:[#allocation13 + $0x78] sm:$0xff] %v2470_v27 }
 0x4f5   :  { %3292 = shalt.err (!%p3289_p6)
}
 0x4f6   :  { %2498 = dma.vmem_to_hbm [thread:$0]  %s2493_s16, 2048, %s3684_s11, [#allocation4], %s3312_s20, %s3312_s20, %s3313_s21  }
 0x4f7   :  { %3309 = dma.done.wait [#allocation4], 2048  }
 0x4f8   :  { %3310 = vsyncadd [#allocation4], 4294965248 }
 0x4f9   :  { %2502 = vsyncpa [#allocation3], 1 }
 0x4fa   :  { %2503 = vsyncpa [#allocation6], 1 }
 0x4fb   :  { %2504 = vsyncpa [#allocation9], 1 }
 0x4fc   :  { %2505 = vsyncpa [#allocation12], 1 }
 0x4fd   :  { %2506 = vsyncpa [#allocation4], 1 }

</bundles_post_ra>
